<compile_context>
chip_gen: v7x
topology: tpu7x:2x2x1
jax: 0.10.0
libtpu: 0.0.40
codegen_flags: <defaults>
</compile_context>

<pallas_src>
import functools

import jax
import jax.numpy as jnp
import numpy as np
from jax.experimental import pallas as pl
from jax.experimental.pallas import tpu as pltpu

LN_EPS = 1e-5  # PyTorch nn.LayerNorm default


def _encoder_kernel(n_per_block, seq, heads, head_dim, layers_per_block,
                    x_ref, wqkv_ref, wo_ref, bo_ref, g_ref, bt_ref,
                    w1_ref, b1_ref, w2_ref, b2_ref, o_ref):
    """layers_per_block TransformerBlocks ('original' mode, dropout=0) for one
    batch block.  Grid axis 0 = batch block (parallel), axis 1 = layer block
    (arbitrary); the activation is carried across layer blocks in o_ref (same
    output block revisited -> stays resident in VMEM)."""
    rows = n_per_block * seq
    embed = heads * head_dim

    # First layer block: pull the input into the VMEM-resident activation carry.
    @pl.when(pl.program_id(1) == 0)
    def _():
        o_ref[...] = x_ref[...]

    def split_heads(z2d):
        # (rows, E) -> (H * n_pb, S, hd), head-major batch.  One-time per-head
        # relayout (static lane slices + leading-axis concat), amortized over a
        # whole layer of lane-dense matmuls.
        parts = [z2d[:, h * head_dim:(h + 1) * head_dim]
                 .reshape(n_per_block, seq, head_dim) for h in range(heads)]
        return jnp.concatenate(parts, axis=0)

    def merge_heads(zb):
        # (H * n_pb, S, hd) -> (rows, E) with columns ordered (head, dim),
        # i.e. the torch concat-of-heads layout expected by fc_out.
        parts = [zb[h * n_per_block:(h + 1) * n_per_block]
                 .reshape(rows, head_dim) for h in range(heads)]
        return jnp.concatenate(parts, axis=-1)

    def layer_norm(z, gamma, beta):
        mu = jnp.mean(z, axis=-1, keepdims=True)
        zc = z - mu                                   # two-pass: no cancellation
        var = jnp.mean(zc * zc, axis=-1, keepdims=True)
        return zc * jax.lax.rsqrt(var + LN_EPS) * gamma + beta

    def one_layer(j, x):                              # x: (rows, E) f32
        # ---- fused QKV projection: ONE lane-dense bf16 MXU matmul -----------
        # (per-head values/keys/queries weights and the 1/sqrt(E) softmax scale
        # were folded into this weight in the wrapper).
        qkv = jnp.dot(x.astype(jnp.bfloat16), wqkv_ref[j],
                      preferred_element_type=jnp.float32)        # (rows, 3E)
        qkvb = qkv.astype(jnp.bfloat16)
        v_b = split_heads(qkvb[:, :embed])
        k_b = split_heads(qkvb[:, embed:2 * embed])
        q_b = split_heads(qkvb[:, 2 * embed:])                   # pre-scaled

        # ---- attention (batched over heads * batch, f32 statistics) ---------
        energy = jnp.einsum('bqd,bkd->bqk', q_b, k_b,
                            preferred_element_type=jnp.float32)
        energy = energy - jnp.max(energy, axis=-1, keepdims=True)
        p = jnp.exp(energy)
        attn = p * pl.reciprocal(jnp.sum(p, axis=-1, keepdims=True), approx=True)
        ctx = jnp.einsum('bqk,bkd->bqd', attn.astype(jnp.bfloat16), v_b,
                         preferred_element_type=jnp.float32)     # (H*n_pb, S, hd)

        # ---- fused output projection: one (rows,E)x(E,E) bf16 matmul --------
        attn_out = jnp.dot(merge_heads(ctx).astype(jnp.bfloat16), wo_ref[j],
                           preferred_element_type=jnp.float32) + bo_ref[j]

        gamma = g_ref[j]
        beta = bt_ref[j]
        x1 = layer_norm(attn_out + x, gamma, beta)               # dropout p=0

        # ---- feed-forward (bf16 matmuls, f32 elementwise) -------------------
        h1 = jnp.maximum(
            jnp.dot(x1.astype(jnp.bfloat16), w1_ref[j],
                    preferred_element_type=jnp.float32) + b1_ref[j], 0.0)
        ff = jnp.dot(h1.astype(jnp.bfloat16), w2_ref[j],
                     preferred_element_type=jnp.float32) + b2_ref[j]
        return layer_norm(ff + x1, gamma, beta)

    o_ref[...] = jax.lax.fori_loop(0, layers_per_block, one_layer, o_ref[...],
                                   unroll=True)


def transformer_encoder_pallas(x, wqkv, layers, heads, *,
                               batch_blocks=1, layers_per_block=None):
    """Run the full TransformerEncoder (all layers) in a single pallas_call.

    x: (N, S, E).  wqkv: (E, 3E) shared, columns [V | K | Q].  layers: list of
    per-layer tuples (wv, wk, wq, wo, bo, gamma, beta, w1, b1, w2, b2) in math
    layout (in, out).
    batch_blocks: keep equal to the number of TensorCores (1 on v5e/v6e, 2 on
    v7x when N divides) -- each extra block re-streams all layer weights.
    layers_per_block: layers processed per grid step; None = auto (all layers
    resident when the weight set is small, else stream one layer at a time).
    """
    N, S, E = x.shape
    H = heads
    hd = E // heads
    assert hd * H == E
    L = len(layers)
    assert N % batch_blocks == 0
    n_pb = N // batch_blocks
    rows = n_pb * S
    assert batch_blocks == 1 or rows % 8 == 0

    # ---- wrapper-side weight folding / stacking (one-time, zero kernel cost) -
    scale = 1.0 / float(np.sqrt(E))                  # energy / embed_size ** 0.5
    wqkv_c = wqkv.astype(jnp.float32).reshape(E, 3, H, hd)   # chunks: V | K | Q

    wqkv_l, wo_l, bo_l, g_l, bt_l = [], [], [], [], []
    w1_l, b1_l, w2_l, b2_l = [], [], [], []
    for (wv, wk, wq, wo, bo, gamma, beta, w1, b1, w2, b2) in layers:
        fv = jnp.einsum('ehd,df->ehf', wqkv_c[:, 0], wv)
        fk = jnp.einsum('ehd,df->ehf', wqkv_c[:, 1], wk)
        fq = jnp.einsum('ehd,df->ehf', wqkv_c[:, 2], wq) * scale  # fold 1/sqrt(E)
        # columns ordered (component, head, dim) -> one (E, 3E) fused weight
        wqkv_l.append(jnp.stack([fv, fk, fq], axis=1).reshape(E, 3 * E))
        wo_l.append(wo)
        bo_l.append(bo)
        g_l.append(gamma)
        bt_l.append(beta)
        w1_l.append(w1)
        b1_l.append(b1)
        w2_l.append(w2)
        b2_l.append(b2)

    bf16, f32 = jnp.bfloat16, jnp.float32

    def stack(ws, dtype):
        return jnp.stack(ws).astype(dtype)

    stacks = (stack(wqkv_l, bf16), stack(wo_l, bf16), stack(bo_l, f32),
              stack(g_l, f32), stack(bt_l, f32),
              stack(w1_l, bf16), stack(b1_l, f32),
              stack(w2_l, bf16), stack(b2_l, f32))

    per_layer_bytes = sum(int(np.prod(a.shape[1:])) * a.dtype.itemsize
                          for a in stacks)
    if layers_per_block is None:
        # Tiny weight set -> collapse the layer grid axis (per-grid-step
        # overhead dominated regime); otherwise stream one layer per step.
        layers_per_block = L if L * per_layer_bytes <= (8 << 20) else 1
    assert L % layers_per_block == 0

    # VMEM budget: double-buffered weight blocks + activation carry + margin.
    # NOTE: at production E/F on v7x (64 MiB physical VMEM) a single layer may
    # not fit double-buffered -- split w1/w2 streaming into F-chunks there.
    vmem_limit = int(2 * per_layer_bytes * layers_per_block
                     + 8 * rows * E * 4 + (4 << 20))
    vmem_limit = min(max(vmem_limit, 32 << 20), 128 << 20)

    def layer_spec(arr):
        nd = arr.ndim
        return pl.BlockSpec((layers_per_block,) + tuple(arr.shape[1:]),
                            lambda b, l, _nd=nd: (l,) + (0,) * (_nd - 1))

    x2 = x.reshape(N * S, E).astype(jnp.float32)
    kernel = functools.partial(_encoder_kernel, n_pb, S, H, hd, layers_per_block)

    out = pl.pallas_call(
        kernel,
        out_shape=jax.ShapeDtypeStruct((N * S, E), jnp.float32),
        grid_spec=pltpu.PrefetchScalarGridSpec(
            num_scalar_prefetch=0,
            grid=(batch_blocks, L // layers_per_block),
            in_specs=[pl.BlockSpec((rows, E), lambda b, l: (b, 0))]   # x: read once
                     + [layer_spec(a) for a in stacks],               # layer weights
            out_specs=pl.BlockSpec((rows, E), lambda b, l: (b, 0)),   # VMEM carry
        ),
        compiler_params=pltpu.CompilerParams(
            dimension_semantics=("parallel", "arbitrary"),
            vmem_limit_bytes=vmem_limit),
    )(x2, *stacks)
    return out.reshape(N, S, E)


# ---------------- pure-JAX reference (mirrors the PyTorch forward) ------------
def _ref_layer_norm(z, gamma, beta):
    mu = jnp.mean(z, axis=-1, keepdims=True)
    var = jnp.mean((z - mu) ** 2, axis=-1, keepdims=True)
    return (z - mu) / jnp.sqrt(var + LN_EPS) * gamma + beta


def transformer_encoder_ref(x, wqkv, layers, heads):
    N, S, E = x.shape
    hd = E // heads
    for (wv, wk, wq, wo, bo, gamma, beta, w1, b1, w2, b2) in layers:
        qkv = x @ wqkv
        value_in, key_in, query_in = jnp.split(qkv, 3, axis=-1)
        vals = value_in.reshape(N, S, heads, hd) @ wv
        keys = key_in.reshape(N, S, heads, hd) @ wk
        qs = query_in.reshape(N, S, heads, hd) @ wq
        energy = jnp.einsum('nqhd,nkhd->nhqk', qs, keys)
        attn = jax.nn.softmax(energy / jnp.sqrt(jnp.float32(E)), axis=3)
        out = jnp.einsum('nhql,nlhd->nqhd', attn, vals).reshape(N, S, E)
        attn_out = out @ wo + bo
        x1 = _ref_layer_norm(attn_out + x, gamma, beta)
        ff = jnp.maximum(x1 @ w1 + b1, 0.0) @ w2 + b2
        x = _ref_layer_norm(ff + x1, gamma, beta)
    return x


# ---------------------------------- main --------------------------------------
if __name__ == "__main__":
    # Small shapes consistent with the module.
    N, S = 2, 8
    embed_size = 32
    heads = 4
    head_dim = embed_size // heads
    forward_expansion = 2
    num_layers = 2
    F = forward_expansion * embed_size

    keys = iter(jax.random.split(jax.random.PRNGKey(0), 32))

    # Deterministic synthetic parameters (math layout: W is (in, out), y = x @ W + b).
    wqkv = 0.05 * jax.random.normal(next(keys), (embed_size, 3 * embed_size),
                                    jnp.float32)

    layers = []
    for _ in range(num_layers):
        wv = 0.1 * jax.random.normal(next(keys), (head_dim, head_dim), jnp.float32)
        wk = 0.1 * jax.random.normal(next(keys), (head_dim, head_dim), jnp.float32)
        wq = 0.1 * jax.random.normal(next(keys), (head_dim, head_dim), jnp.float32)
        wo = 0.05 * jax.random.normal(next(keys), (embed_size, embed_size), jnp.float32)
        bo = 0.01 * jax.random.normal(next(keys), (1, embed_size), jnp.float32)
        gamma = jnp.ones((1, embed_size), jnp.float32)
        beta = jnp.zeros((1, embed_size), jnp.float32)
        w1 = 0.05 * jax.random.normal(next(keys), (embed_size, F), jnp.float32)
        b1 = 0.01 * jax.random.normal(next(keys), (1, F), jnp.float32)
        w2 = 0.05 * jax.random.normal(next(keys), (F, embed_size), jnp.float32)
        b2 = 0.01 * jax.random.normal(next(keys), (1, embed_size), jnp.float32)
        layers.append((wv, wk, wq, wo, bo, gamma, beta, w1, b1, w2, b2))

    x = jax.random.normal(next(keys), (N, S, embed_size), jnp.float32)

    out = transformer_encoder_pallas(x, wqkv, layers, heads, batch_blocks=1)
    out = jax.block_until_ready(out)

    ref = transformer_encoder_ref(x, wqkv, layers, heads)
    # Tolerance covers bf16 MXU operands (+ folded-weight association order and
    # the approximate softmax reciprocal) vs the f32 reference.
    np.testing.assert_allclose(np.asarray(out), np.asarray(ref),
                               rtol=2e-2, atol=2e-2)

    print("KERNEL_OK")
</pallas_src>

<mosaic_0001>
module attributes {stable_mosaic.version = 11 : i64} {
  func.func @_encoder_kernel(%arg0: i32, %arg1: i32, %arg2: memref<16x32xf32, #tpu.memory_space<vmem>>, %arg3: memref<2x32x96xbf16, #tpu.memory_space<vmem>>, %arg4: memref<2x32x32xbf16, #tpu.memory_space<vmem>>, %arg5: memref<2x1x32xf32, #tpu.memory_space<vmem>>, %arg6: memref<2x1x32xf32, #tpu.memory_space<vmem>>, %arg7: memref<2x1x32xf32, #tpu.memory_space<vmem>>, %arg8: memref<2x32x64xbf16, #tpu.memory_space<vmem>>, %arg9: memref<2x1x64xf32, #tpu.memory_space<vmem>>, %arg10: memref<2x64x32xbf16, #tpu.memory_space<vmem>>, %arg11: memref<2x1x32xf32, #tpu.memory_space<vmem>>, %arg12: memref<16x32xf32, #tpu.memory_space<vmem>>) attributes {dimension_semantics = [#tpu.dimension_semantics<parallel>, #tpu.dimension_semantics<arbitrary>], iteration_bounds = array<i64: 1, 1>, scalar_prefetch = 0 : i64, scratch_operands = 0 : i64, tpu.core_type = #tpu.core_type<tc>, window_params = [{transform_indices = @transform_0, window_bounds = array<i64: 16, 32>}, {transform_indices = @transform_1, window_bounds = array<i64: 2, 32, 96>}, {transform_indices = @transform_2, window_bounds = array<i64: 2, 32, 32>}, {transform_indices = @transform_3, window_bounds = array<i64: 2, 1, 32>}, {transform_indices = @transform_4, window_bounds = array<i64: 2, 1, 32>}, {transform_indices = @transform_5, window_bounds = array<i64: 2, 1, 32>}, {transform_indices = @transform_6, window_bounds = array<i64: 2, 32, 64>}, {transform_indices = @transform_7, window_bounds = array<i64: 2, 1, 64>}, {transform_indices = @transform_8, window_bounds = array<i64: 2, 64, 32>}, {transform_indices = @transform_9, window_bounds = array<i64: 2, 1, 32>}, {transform_indices = @transform_10, window_bounds = array<i64: 16, 32>}]} {
    %c0_i32 = arith.constant 0 : i32
    %0 = arith.cmpi eq, %arg1, %c0_i32 : i32
    %1 = arith.extui %0 : i1 to i32
    %c0_i32_0 = arith.constant 0 : i32
    %2 = arith.cmpi ne, %1, %c0_i32_0 : i32
    scf.if %2 {
      %c0_78 = arith.constant 0 : index
      %c0_79 = arith.constant 0 : index
      %281 = vector.load %arg2[%c0_78, %c0_79] : memref<16x32xf32, #tpu.memory_space<vmem>>, vector<16x32xf32>
      %c0_80 = arith.constant 0 : index
      %c0_81 = arith.constant 0 : index
      %282 = vector.load %arg12[%c0_80, %c0_81] : memref<16x32xf32, #tpu.memory_space<vmem>>, vector<16x32xf32>
      tpu.vector_store %arg12[%c0_80, %c0_81], %281 {strides = array<i32>} : memref<16x32xf32, #tpu.memory_space<vmem>>, vector<16x32xf32>,
    } else {
    }
    %c0 = arith.constant 0 : index
    %c0_1 = arith.constant 0 : index
    %3 = vector.load %arg12[%c0, %c0_1] : memref<16x32xf32, #tpu.memory_space<vmem>>, vector<16x32xf32>
    %c0_i32_2 = arith.constant 0 : i32
    %4 = arith.truncf %3 : vector<16x32xf32> to vector<16x32xbf16>
    %5 = arith.index_cast %c0_i32_2 : i32 to index
    %c0_3 = arith.constant 0 : index
    %c0_4 = arith.constant 0 : index
    %6 = vector.load %arg3[%5, %c0_3, %c0_4] : memref<2x32x96xbf16, #tpu.memory_space<vmem>>, vector<1x32x96xbf16>
    %7 = vector.shape_cast %6 : vector<1x32x96xbf16> to vector<32x96xbf16>
    %cst = arith.constant dense<0.000000e+00> : vector<16x96xf32>
    %8 = tpu.matmul %4, %7, %cst {dimension_numbers = #tpu.dot_dimension_numbers<[1], [0], [0], [1], [0, 0, 1, 1], [], []>} : vector<16x32xbf16>, vector<32x96xbf16>, vector<16x96xf32> -> vector<16x96xf32>
    %9 = arith.truncf %8 : vector<16x96xf32> to vector<16x96xbf16>
    %10 = vector.extract_strided_slice %9 {offsets = [0, 0], sizes = [16, 32], strides = [1, 1]} : vector<16x96xbf16> to vector<16x32xbf16>
    %11 = vector.extract_strided_slice %10 {offsets = [0, 0], sizes = [16, 8], strides = [1, 1]} : vector<16x32xbf16> to vector<16x8xbf16>
    %12 = vector.shape_cast %11 : vector<16x8xbf16> to vector<2x8x8xbf16>
    %13 = vector.extract_strided_slice %10 {offsets = [0, 8], sizes = [16, 8], strides = [1, 1]} : vector<16x32xbf16> to vector<16x8xbf16>
    %14 = vector.shape_cast %13 : vector<16x8xbf16> to vector<2x8x8xbf16>
    %15 = vector.extract_strided_slice %10 {offsets = [0, 16], sizes = [16, 8], strides = [1, 1]} : vector<16x32xbf16> to vector<16x8xbf16>
    %16 = vector.shape_cast %15 : vector<16x8xbf16> to vector<2x8x8xbf16>
    %17 = vector.extract_strided_slice %10 {offsets = [0, 24], sizes = [16, 8], strides = [1, 1]} : vector<16x32xbf16> to vector<16x8xbf16>
    %18 = vector.shape_cast %17 : vector<16x8xbf16> to vector<2x8x8xbf16>
    %19 = tpu.concatenate %12, %14, %16, %18 in 0 : vector<2x8x8xbf16>, vector<2x8x8xbf16>, vector<2x8x8xbf16>, vector<2x8x8xbf16> -> vector<8x8x8xbf16>
    %20 = vector.extract_strided_slice %9 {offsets = [0, 32], sizes = [16, 32], strides = [1, 1]} : vector<16x96xbf16> to vector<16x32xbf16>
    %21 = vector.extract_strided_slice %20 {offsets = [0, 0], sizes = [16, 8], strides = [1, 1]} : vector<16x32xbf16> to vector<16x8xbf16>
    %22 = vector.shape_cast %21 : vector<16x8xbf16> to vector<2x8x8xbf16>
    %23 = vector.extract_strided_slice %20 {offsets = [0, 8], sizes = [16, 8], strides = [1, 1]} : vector<16x32xbf16> to vector<16x8xbf16>
    %24 = vector.shape_cast %23 : vector<16x8xbf16> to vector<2x8x8xbf16>
    %25 = vector.extract_strided_slice %20 {offsets = [0, 16], sizes = [16, 8], strides = [1, 1]} : vector<16x32xbf16> to vector<16x8xbf16>
    %26 = vector.shape_cast %25 : vector<16x8xbf16> to vector<2x8x8xbf16>
    %27 = vector.extract_strided_slice %20 {offsets = [0, 24], sizes = [16, 8], strides = [1, 1]} : vector<16x32xbf16> to vector<16x8xbf16>
    %28 = vector.shape_cast %27 : vector<16x8xbf16> to vector<2x8x8xbf16>
    %29 = tpu.concatenate %22, %24, %26, %28 in 0 : vector<2x8x8xbf16>, vector<2x8x8xbf16>, vector<2x8x8xbf16>, vector<2x8x8xbf16> -> vector<8x8x8xbf16>
    %30 = vector.extract_strided_slice %9 {offsets = [0, 64], sizes = [16, 32], strides = [1, 1]} : vector<16x96xbf16> to vector<16x32xbf16>
    %31 = vector.extract_strided_slice %30 {offsets = [0, 0], sizes = [16, 8], strides = [1, 1]} : vector<16x32xbf16> to vector<16x8xbf16>
    %32 = vector.shape_cast %31 : vector<16x8xbf16> to vector<2x8x8xbf16>
    %33 = vector.extract_strided_slice %30 {offsets = [0, 8], sizes = [16, 8], strides = [1, 1]} : vector<16x32xbf16> to vector<16x8xbf16>
    %34 = vector.shape_cast %33 : vector<16x8xbf16> to vector<2x8x8xbf16>
    %35 = vector.extract_strided_slice %30 {offsets = [0, 16], sizes = [16, 8], strides = [1, 1]} : vector<16x32xbf16> to vector<16x8xbf16>
    %36 = vector.shape_cast %35 : vector<16x8xbf16> to vector<2x8x8xbf16>
    %37 = vector.extract_strided_slice %30 {offsets = [0, 24], sizes = [16, 8], strides = [1, 1]} : vector<16x32xbf16> to vector<16x8xbf16>
    %38 = vector.shape_cast %37 : vector<16x8xbf16> to vector<2x8x8xbf16>
    %39 = tpu.concatenate %32, %34, %36, %38 in 0 : vector<2x8x8xbf16>, vector<2x8x8xbf16>, vector<2x8x8xbf16>, vector<2x8x8xbf16> -> vector<8x8x8xbf16>
    "tpu.trace_start"() <{level = 10 : i32, message = "bqd,bkd->bqk"}> : () -> ()
    %cst_5 = arith.constant dense<0.000000e+00> : vector<8x8x8xf32>
    %40 = tpu.matmul %39, %29, %cst_5 {dimension_numbers = #tpu.dot_dimension_numbers<[2], [2], [1], [1], [0, 0, 0, 1, 1, 1], [0], [0]>} : vector<8x8x8xbf16>, vector<8x8x8xbf16>, vector<8x8x8xf32> -> vector<8x8x8xf32>
    "tpu.trace_stop"() : () -> ()
    %cst_6 = arith.constant dense<0xFF800000> : vector<8x8xf32>
    %41 = vector.multi_reduction <maximumf>, %40, %cst_6 [2] : vector<8x8x8xf32> to vector<8x8xf32>
    %42 = vector.shape_cast %41 : vector<8x8xf32> to vector<8x8x1xf32>
    %43 = vector.broadcast %42 : vector<8x8x1xf32> to vector<8x8x8xf32>
    %44 = arith.subf %40, %43 : vector<8x8x8xf32>
    %45 = math.exp %44 : vector<8x8x8xf32>
    %cst_7 = arith.constant dense<0.000000e+00> : vector<8x8xf32>
    %46 = vector.multi_reduction <add>, %45, %cst_7 [2] : vector<8x8x8xf32> to vector<8x8xf32>
    %47 = vector.shape_cast %46 : vector<8x8xf32> to vector<8x8x1xf32>
    %48 = tpu.reciprocal %47 {approx = true} : vector<8x8x1xf32> -> vector<8x8x1xf32>
    %49 = vector.broadcast %48 : vector<8x8x1xf32> to vector<8x8x8xf32>
    %50 = arith.mulf %45, %49 : vector<8x8x8xf32>
    %51 = arith.truncf %50 : vector<8x8x8xf32> to vector<8x8x8xbf16>
    "tpu.trace_start"() <{level = 10 : i32, message = "bqk,bkd->bqd"}> : () -> ()
    %cst_8 = arith.constant dense<0.000000e+00> : vector<8x8x8xf32>
    %52 = tpu.matmul %51, %19, %cst_8 {dimension_numbers = #tpu.dot_dimension_numbers<[2], [1], [1], [2], [0, 0, 0, 1, 1, 2], [0], [0]>} : vector<8x8x8xbf16>, vector<8x8x8xbf16>, vector<8x8x8xf32> -> vector<8x8x8xf32>
    "tpu.trace_stop"() : () -> ()
    %53 = vector.extract_strided_slice %52 {offsets = [0, 0, 0], sizes = [2, 8, 8], strides = [1, 1, 1]} : vector<8x8x8xf32> to vector<2x8x8xf32>
    %54 = vector.shape_cast %53 : vector<2x8x8xf32> to vector<16x8xf32>
    %55 = vector.extract_strided_slice %52 {offsets = [2, 0, 0], sizes = [2, 8, 8], strides = [1, 1, 1]} : vector<8x8x8xf32> to vector<2x8x8xf32>
    %56 = vector.shape_cast %55 : vector<2x8x8xf32> to vector<16x8xf32>
    %57 = vector.extract_strided_slice %52 {offsets = [4, 0, 0], sizes = [2, 8, 8], strides = [1, 1, 1]} : vector<8x8x8xf32> to vector<2x8x8xf32>
    %58 = vector.shape_cast %57 : vector<2x8x8xf32> to vector<16x8xf32>
    %59 = vector.extract_strided_slice %52 {offsets = [6, 0, 0], sizes = [2, 8, 8], strides = [1, 1, 1]} : vector<8x8x8xf32> to vector<2x8x8xf32>
    %60 = vector.shape_cast %59 : vector<2x8x8xf32> to vector<16x8xf32>
    %61 = tpu.concatenate %54, %56, %58, %60 in 1 : vector<16x8xf32>, vector<16x8xf32>, vector<16x8xf32>, vector<16x8xf32> -> vector<16x32xf32>
    %62 = arith.truncf %61 : vector<16x32xf32> to vector<16x32xbf16>
    %63 = arith.index_cast %c0_i32_2 : i32 to index
    %c0_9 = arith.constant 0 : index
    %c0_10 = arith.constant 0 : index
    %64 = vector.load %arg4[%63, %c0_9, %c0_10] : memref<2x32x32xbf16, #tpu.memory_space<vmem>>, vector<1x32x32xbf16>
    %65 = vector.shape_cast %64 : vector<1x32x32xbf16> to vector<32x32xbf16>
    %cst_11 = arith.constant dense<0.000000e+00> : vector<16x32xf32>
    %66 = tpu.matmul %62, %65, %cst_11 {dimension_numbers = #tpu.dot_dimension_numbers<[1], [0], [0], [1], [0, 0, 1, 1], [], []>} : vector<16x32xbf16>, vector<32x32xbf16>, vector<16x32xf32> -> vector<16x32xf32>
    %67 = arith.index_cast %c0_i32_2 : i32 to index
    %c0_12 = arith.constant 0 : index
    %c0_13 = arith.constant 0 : index
    %68 = vector.load %arg5[%67, %c0_12, %c0_13] : memref<2x1x32xf32, #tpu.memory_space<vmem>>, vector<1x1x32xf32>
    %69 = vector.shape_cast %68 : vector<1x1x32xf32> to vector<1x32xf32>
    %70 = vector.broadcast %69 : vector<1x32xf32> to vector<16x32xf32>
    %71 = arith.addf %66, %70 : vector<16x32xf32>
    %72 = arith.index_cast %c0_i32_2 : i32 to index
    %c0_14 = arith.constant 0 : index
    %c0_15 = arith.constant 0 : index
    %73 = vector.load %arg6[%72, %c0_14, %c0_15] : memref<2x1x32xf32, #tpu.memory_space<vmem>>, vector<1x1x32xf32>
    %74 = vector.shape_cast %73 : vector<1x1x32xf32> to vector<1x32xf32>
    %75 = arith.index_cast %c0_i32_2 : i32 to index
    %c0_16 = arith.constant 0 : index
    %c0_17 = arith.constant 0 : index
    %76 = vector.load %arg7[%75, %c0_16, %c0_17] : memref<2x1x32xf32, #tpu.memory_space<vmem>>, vector<1x1x32xf32>
    %77 = vector.shape_cast %76 : vector<1x1x32xf32> to vector<1x32xf32>
    %78 = arith.addf %71, %3 : vector<16x32xf32>
    %cst_18 = arith.constant dense<0.000000e+00> : vector<16xf32>
    %79 = vector.multi_reduction <add>, %78, %cst_18 [1] : vector<16x32xf32> to vector<16xf32>
    %80 = vector.shape_cast %79 : vector<16xf32> to vector<16x1xf32>
    %cst_19 = arith.constant 3.200000e+01 : f32
    %81 = vector.broadcast %cst_19 : f32 to vector<16x1xf32>
    %82 = arith.divf %80, %81 : vector<16x1xf32>
    %83 = vector.broadcast %82 : vector<16x1xf32> to vector<16x32xf32>
    %84 = arith.subf %78, %83 : vector<16x32xf32>
    %85 = arith.mulf %84, %84 : vector<16x32xf32>
    %cst_20 = arith.constant dense<0.000000e+00> : vector<16xf32>
    %86 = vector.multi_reduction <add>, %85, %cst_20 [1] : vector<16x32xf32> to vector<16xf32>
    %87 = vector.shape_cast %86 : vector<16xf32> to vector<16x1xf32>
    %cst_21 = arith.constant 3.200000e+01 : f32
    %88 = vector.broadcast %cst_21 : f32 to vector<16x1xf32>
    %89 = arith.divf %87, %88 : vector<16x1xf32>
    %cst_22 = arith.constant 9.99999974E-6 : f32
    %90 = vector.broadcast %cst_22 : f32 to vector<16x1xf32>
    %91 = arith.addf %89, %90 : vector<16x1xf32>
    %92 = math.rsqrt %91 : vector<16x1xf32>
    %93 = vector.broadcast %92 : vector<16x1xf32> to vector<16x32xf32>
    %94 = arith.mulf %84, %93 : vector<16x32xf32>
    %95 = vector.broadcast %74 : vector<1x32xf32> to vector<16x32xf32>
    %96 = arith.mulf %94, %95 : vector<16x32xf32>
    %97 = vector.broadcast %77 : vector<1x32xf32> to vector<16x32xf32>
    %98 = arith.addf %96, %97 : vector<16x32xf32>
    %99 = arith.truncf %98 : vector<16x32xf32> to vector<16x32xbf16>
    %100 = arith.index_cast %c0_i32_2 : i32 to index
    %c0_23 = arith.constant 0 : index
    %c0_24 = arith.constant 0 : index
    %101 = vector.load %arg8[%100, %c0_23, %c0_24] : memref<2x32x64xbf16, #tpu.memory_space<vmem>>, vector<1x32x64xbf16>
    %102 = vector.shape_cast %101 : vector<1x32x64xbf16> to vector<32x64xbf16>
    %cst_25 = arith.constant dense<0.000000e+00> : vector<16x64xf32>
    %103 = tpu.matmul %99, %102, %cst_25 {dimension_numbers = #tpu.dot_dimension_numbers<[1], [0], [0], [1], [0, 0, 1, 1], [], []>} : vector<16x32xbf16>, vector<32x64xbf16>, vector<16x64xf32> -> vector<16x64xf32>
    %104 = arith.index_cast %c0_i32_2 : i32 to index
    %c0_26 = arith.constant 0 : index
    %c0_27 = arith.constant 0 : index
    %105 = vector.load %arg9[%104, %c0_26, %c0_27] : memref<2x1x64xf32, #tpu.memory_space<vmem>>, vector<1x1x64xf32>
    %106 = vector.shape_cast %105 : vector<1x1x64xf32> to vector<1x64xf32>
    %107 = vector.broadcast %106 : vector<1x64xf32> to vector<16x64xf32>
    %108 = arith.addf %103, %107 : vector<16x64xf32>
    %cst_28 = arith.constant 0.000000e+00 : f32
    %109 = vector.broadcast %cst_28 : f32 to vector<16x64xf32>
    %110 = arith.maximumf %108, %109 : vector<16x64xf32>
    %111 = arith.truncf %110 : vector<16x64xf32> to vector<16x64xbf16>
    %112 = arith.index_cast %c0_i32_2 : i32 to index
    %c0_29 = arith.constant 0 : index
    %c0_30 = arith.constant 0 : index
    %113 = vector.load %arg10[%112, %c0_29, %c0_30] : memref<2x64x32xbf16, #tpu.memory_space<vmem>>, vector<1x64x32xbf16>
    %114 = vector.shape_cast %113 : vector<1x64x32xbf16> to vector<64x32xbf16>
    %cst_31 = arith.constant dense<0.000000e+00> : vector<16x32xf32>
    %115 = tpu.matmul %111, %114, %cst_31 {dimension_numbers = #tpu.dot_dimension_numbers<[1], [0], [0], [1], [0, 0, 1, 1], [], []>} : vector<16x64xbf16>, vector<64x32xbf16>, vector<16x32xf32> -> vector<16x32xf32>
    %116 = arith.index_cast %c0_i32_2 : i32 to index
    %c0_32 = arith.constant 0 : index
    %c0_33 = arith.constant 0 : index
    %117 = vector.load %arg11[%116, %c0_32, %c0_33] : memref<2x1x32xf32, #tpu.memory_space<vmem>>, vector<1x1x32xf32>
    %118 = vector.shape_cast %117 : vector<1x1x32xf32> to vector<1x32xf32>
    %119 = vector.broadcast %118 : vector<1x32xf32> to vector<16x32xf32>
    %120 = arith.addf %115, %119 : vector<16x32xf32>
    %121 = arith.addf %120, %98 : vector<16x32xf32>
    %cst_34 = arith.constant dense<0.000000e+00> : vector<16xf32>
    %122 = vector.multi_reduction <add>, %121, %cst_34 [1] : vector<16x32xf32> to vector<16xf32>
    %123 = vector.shape_cast %122 : vector<16xf32> to vector<16x1xf32>
    %cst_35 = arith.constant 3.200000e+01 : f32
    %124 = vector.broadcast %cst_35 : f32 to vector<16x1xf32>
    %125 = arith.divf %123, %124 : vector<16x1xf32>
    %126 = vector.broadcast %125 : vector<16x1xf32> to vector<16x32xf32>
    %127 = arith.subf %121, %126 : vector<16x32xf32>
    %128 = arith.mulf %127, %127 : vector<16x32xf32>
    %cst_36 = arith.constant dense<0.000000e+00> : vector<16xf32>
    %129 = vector.multi_reduction <add>, %128, %cst_36 [1] : vector<16x32xf32> to vector<16xf32>
    %130 = vector.shape_cast %129 : vector<16xf32> to vector<16x1xf32>
    %cst_37 = arith.constant 3.200000e+01 : f32
    %131 = vector.broadcast %cst_37 : f32 to vector<16x1xf32>
    %132 = arith.divf %130, %131 : vector<16x1xf32>
    %cst_38 = arith.constant 9.99999974E-6 : f32
    %133 = vector.broadcast %cst_38 : f32 to vector<16x1xf32>
    %134 = arith.addf %132, %133 : vector<16x1xf32>
    %135 = math.rsqrt %134 : vector<16x1xf32>
    %136 = vector.broadcast %135 : vector<16x1xf32> to vector<16x32xf32>
    %137 = arith.mulf %127, %136 : vector<16x32xf32>
    %138 = vector.broadcast %74 : vector<1x32xf32> to vector<16x32xf32>
    %139 = arith.mulf %137, %138 : vector<16x32xf32>
    %140 = vector.broadcast %77 : vector<1x32xf32> to vector<16x32xf32>
    %141 = arith.addf %139, %140 : vector<16x32xf32>
    %c1_i32 = arith.constant 1 : i32
    %142 = arith.truncf %141 : vector<16x32xf32> to vector<16x32xbf16>
    %143 = arith.index_cast %c1_i32 : i32 to index
    %c0_39 = arith.constant 0 : index
    %c0_40 = arith.constant 0 : index
    %144 = vector.load %arg3[%143, %c0_39, %c0_40] : memref<2x32x96xbf16, #tpu.memory_space<vmem>>, vector<1x32x96xbf16>
    %145 = vector.shape_cast %144 : vector<1x32x96xbf16> to vector<32x96xbf16>
    %cst_41 = arith.constant dense<0.000000e+00> : vector<16x96xf32>
    %146 = tpu.matmul %142, %145, %cst_41 {dimension_numbers = #tpu.dot_dimension_numbers<[1], [0], [0], [1], [0, 0, 1, 1], [], []>} : vector<16x32xbf16>, vector<32x96xbf16>, vector<16x96xf32> -> vector<16x96xf32>
    %147 = arith.truncf %146 : vector<16x96xf32> to vector<16x96xbf16>
    %148 = vector.extract_strided_slice %147 {offsets = [0, 0], sizes = [16, 32], strides = [1, 1]} : vector<16x96xbf16> to vector<16x32xbf16>
    %149 = vector.extract_strided_slice %148 {offsets = [0, 0], sizes = [16, 8], strides = [1, 1]} : vector<16x32xbf16> to vector<16x8xbf16>
    %150 = vector.shape_cast %149 : vector<16x8xbf16> to vector<2x8x8xbf16>
    %151 = vector.extract_strided_slice %148 {offsets = [0, 8], sizes = [16, 8], strides = [1, 1]} : vector<16x32xbf16> to vector<16x8xbf16>
    %152 = vector.shape_cast %151 : vector<16x8xbf16> to vector<2x8x8xbf16>
    %153 = vector.extract_strided_slice %148 {offsets = [0, 16], sizes = [16, 8], strides = [1, 1]} : vector<16x32xbf16> to vector<16x8xbf16>
    %154 = vector.shape_cast %153 : vector<16x8xbf16> to vector<2x8x8xbf16>
    %155 = vector.extract_strided_slice %148 {offsets = [0, 24], sizes = [16, 8], strides = [1, 1]} : vector<16x32xbf16> to vector<16x8xbf16>
    %156 = vector.shape_cast %155 : vector<16x8xbf16> to vector<2x8x8xbf16>
    %157 = tpu.concatenate %150, %152, %154, %156 in 0 : vector<2x8x8xbf16>, vector<2x8x8xbf16>, vector<2x8x8xbf16>, vector<2x8x8xbf16> -> vector<8x8x8xbf16>
    %158 = vector.extract_strided_slice %147 {offsets = [0, 32], sizes = [16, 32], strides = [1, 1]} : vector<16x96xbf16> to vector<16x32xbf16>
    %159 = vector.extract_strided_slice %158 {offsets = [0, 0], sizes = [16, 8], strides = [1, 1]} : vector<16x32xbf16> to vector<16x8xbf16>
    %160 = vector.shape_cast %159 : vector<16x8xbf16> to vector<2x8x8xbf16>
    %161 = vector.extract_strided_slice %158 {offsets = [0, 8], sizes = [16, 8], strides = [1, 1]} : vector<16x32xbf16> to vector<16x8xbf16>
    %162 = vector.shape_cast %161 : vector<16x8xbf16> to vector<2x8x8xbf16>
    %163 = vector.extract_strided_slice %158 {offsets = [0, 16], sizes = [16, 8], strides = [1, 1]} : vector<16x32xbf16> to vector<16x8xbf16>
    %164 = vector.shape_cast %163 : vector<16x8xbf16> to vector<2x8x8xbf16>
    %165 = vector.extract_strided_slice %158 {offsets = [0, 24], sizes = [16, 8], strides = [1, 1]} : vector<16x32xbf16> to vector<16x8xbf16>
    %166 = vector.shape_cast %165 : vector<16x8xbf16> to vector<2x8x8xbf16>
    %167 = tpu.concatenate %160, %162, %164, %166 in 0 : vector<2x8x8xbf16>, vector<2x8x8xbf16>, vector<2x8x8xbf16>, vector<2x8x8xbf16> -> vector<8x8x8xbf16>
    %168 = vector.extract_strided_slice %147 {offsets = [0, 64], sizes = [16, 32], strides = [1, 1]} : vector<16x96xbf16> to vector<16x32xbf16>
    %169 = vector.extract_strided_slice %168 {offsets = [0, 0], sizes = [16, 8], strides = [1, 1]} : vector<16x32xbf16> to vector<16x8xbf16>
    %170 = vector.shape_cast %169 : vector<16x8xbf16> to vector<2x8x8xbf16>
    %171 = vector.extract_strided_slice %168 {offsets = [0, 8], sizes = [16, 8], strides = [1, 1]} : vector<16x32xbf16> to vector<16x8xbf16>
    %172 = vector.shape_cast %171 : vector<16x8xbf16> to vector<2x8x8xbf16>
    %173 = vector.extract_strided_slice %168 {offsets = [0, 16], sizes = [16, 8], strides = [1, 1]} : vector<16x32xbf16> to vector<16x8xbf16>
    %174 = vector.shape_cast %173 : vector<16x8xbf16> to vector<2x8x8xbf16>
    %175 = vector.extract_strided_slice %168 {offsets = [0, 24], sizes = [16, 8], strides = [1, 1]} : vector<16x32xbf16> to vector<16x8xbf16>
    %176 = vector.shape_cast %175 : vector<16x8xbf16> to vector<2x8x8xbf16>
    %177 = tpu.concatenate %170, %172, %174, %176 in 0 : vector<2x8x8xbf16>, vector<2x8x8xbf16>, vector<2x8x8xbf16>, vector<2x8x8xbf16> -> vector<8x8x8xbf16>
    "tpu.trace_start"() <{level = 10 : i32, message = "bqd,bkd->bqk"}> : () -> ()
    %cst_42 = arith.constant dense<0.000000e+00> : vector<8x8x8xf32>
    %178 = tpu.matmul %177, %167, %cst_42 {dimension_numbers = #tpu.dot_dimension_numbers<[2], [2], [1], [1], [0, 0, 0, 1, 1, 1], [0], [0]>} : vector<8x8x8xbf16>, vector<8x8x8xbf16>, vector<8x8x8xf32> -> vector<8x8x8xf32>
    "tpu.trace_stop"() : () -> ()
    %cst_43 = arith.constant dense<0xFF800000> : vector<8x8xf32>
    %179 = vector.multi_reduction <maximumf>, %178, %cst_43 [2] : vector<8x8x8xf32> to vector<8x8xf32>
    %180 = vector.shape_cast %179 : vector<8x8xf32> to vector<8x8x1xf32>
    %181 = vector.broadcast %180 : vector<8x8x1xf32> to vector<8x8x8xf32>
    %182 = arith.subf %178, %181 : vector<8x8x8xf32>
    %183 = math.exp %182 : vector<8x8x8xf32>
    %cst_44 = arith.constant dense<0.000000e+00> : vector<8x8xf32>
    %184 = vector.multi_reduction <add>, %183, %cst_44 [2] : vector<8x8x8xf32> to vector<8x8xf32>
    %185 = vector.shape_cast %184 : vector<8x8xf32> to vector<8x8x1xf32>
    %186 = tpu.reciprocal %185 {approx = true} : vector<8x8x1xf32> -> vector<8x8x1xf32>
    %187 = vector.broadcast %186 : vector<8x8x1xf32> to vector<8x8x8xf32>
    %188 = arith.mulf %183, %187 : vector<8x8x8xf32>
    %189 = arith.truncf %188 : vector<8x8x8xf32> to vector<8x8x8xbf16>
    "tpu.trace_start"() <{level = 10 : i32, message = "bqk,bkd->bqd"}> : () -> ()
    %cst_45 = arith.constant dense<0.000000e+00> : vector<8x8x8xf32>
    %190 = tpu.matmul %189, %157, %cst_45 {dimension_numbers = #tpu.dot_dimension_numbers<[2], [1], [1], [2], [0, 0, 0, 1, 1, 2], [0], [0]>} : vector<8x8x8xbf16>, vector<8x8x8xbf16>, vector<8x8x8xf32> -> vector<8x8x8xf32>
    "tpu.trace_stop"() : () -> ()
    %191 = vector.extract_strided_slice %190 {offsets = [0, 0, 0], sizes = [2, 8, 8], strides = [1, 1, 1]} : vector<8x8x8xf32> to vector<2x8x8xf32>
    %192 = vector.shape_cast %191 : vector<2x8x8xf32> to vector<16x8xf32>
    %193 = vector.extract_strided_slice %190 {offsets = [2, 0, 0], sizes = [2, 8, 8], strides = [1, 1, 1]} : vector<8x8x8xf32> to vector<2x8x8xf32>
    %194 = vector.shape_cast %193 : vector<2x8x8xf32> to vector<16x8xf32>
    %195 = vector.extract_strided_slice %190 {offsets = [4, 0, 0], sizes = [2, 8, 8], strides = [1, 1, 1]} : vector<8x8x8xf32> to vector<2x8x8xf32>
    %196 = vector.shape_cast %195 : vector<2x8x8xf32> to vector<16x8xf32>
    %197 = vector.extract_strided_slice %190 {offsets = [6, 0, 0], sizes = [2, 8, 8], strides = [1, 1, 1]} : vector<8x8x8xf32> to vector<2x8x8xf32>
    %198 = vector.shape_cast %197 : vector<2x8x8xf32> to vector<16x8xf32>
    %199 = tpu.concatenate %192, %194, %196, %198 in 1 : vector<16x8xf32>, vector<16x8xf32>, vector<16x8xf32>, vector<16x8xf32> -> vector<16x32xf32>
    %200 = arith.truncf %199 : vector<16x32xf32> to vector<16x32xbf16>
    %201 = arith.index_cast %c1_i32 : i32 to index
    %c0_46 = arith.constant 0 : index
    %c0_47 = arith.constant 0 : index
    %202 = vector.load %arg4[%201, %c0_46, %c0_47] : memref<2x32x32xbf16, #tpu.memory_space<vmem>>, vector<1x32x32xbf16>
    %203 = vector.shape_cast %202 : vector<1x32x32xbf16> to vector<32x32xbf16>
    %cst_48 = arith.constant dense<0.000000e+00> : vector<16x32xf32>
    %204 = tpu.matmul %200, %203, %cst_48 {dimension_numbers = #tpu.dot_dimension_numbers<[1], [0], [0], [1], [0, 0, 1, 1], [], []>} : vector<16x32xbf16>, vector<32x32xbf16>, vector<16x32xf32> -> vector<16x32xf32>
    %205 = arith.index_cast %c1_i32 : i32 to index
    %c0_49 = arith.constant 0 : index
    %c0_50 = arith.constant 0 : index
    %206 = vector.load %arg5[%205, %c0_49, %c0_50] : memref<2x1x32xf32, #tpu.memory_space<vmem>>, vector<1x1x32xf32>
    %207 = vector.shape_cast %206 : vector<1x1x32xf32> to vector<1x32xf32>
    %208 = vector.broadcast %207 : vector<1x32xf32> to vector<16x32xf32>
    %209 = arith.addf %204, %208 : vector<16x32xf32>
    %210 = arith.index_cast %c1_i32 : i32 to index
    %c0_51 = arith.constant 0 : index
    %c0_52 = arith.constant 0 : index
    %211 = vector.load %arg6[%210, %c0_51, %c0_52] : memref<2x1x32xf32, #tpu.memory_space<vmem>>, vector<1x1x32xf32>
    %212 = vector.shape_cast %211 : vector<1x1x32xf32> to vector<1x32xf32>
    %213 = arith.index_cast %c1_i32 : i32 to index
    %c0_53 = arith.constant 0 : index
    %c0_54 = arith.constant 0 : index
    %214 = vector.load %arg7[%213, %c0_53, %c0_54] : memref<2x1x32xf32, #tpu.memory_space<vmem>>, vector<1x1x32xf32>
    %215 = vector.shape_cast %214 : vector<1x1x32xf32> to vector<1x32xf32>
    %216 = arith.addf %209, %141 : vector<16x32xf32>
    %cst_55 = arith.constant dense<0.000000e+00> : vector<16xf32>
    %217 = vector.multi_reduction <add>, %216, %cst_55 [1] : vector<16x32xf32> to vector<16xf32>
    %218 = vector.shape_cast %217 : vector<16xf32> to vector<16x1xf32>
    %cst_56 = arith.constant 3.200000e+01 : f32
    %219 = vector.broadcast %cst_56 : f32 to vector<16x1xf32>
    %220 = arith.divf %218, %219 : vector<16x1xf32>
    %221 = vector.broadcast %220 : vector<16x1xf32> to vector<16x32xf32>
    %222 = arith.subf %216, %221 : vector<16x32xf32>
    %223 = arith.mulf %222, %222 : vector<16x32xf32>
    %cst_57 = arith.constant dense<0.000000e+00> : vector<16xf32>
    %224 = vector.multi_reduction <add>, %223, %cst_57 [1] : vector<16x32xf32> to vector<16xf32>
    %225 = vector.shape_cast %224 : vector<16xf32> to vector<16x1xf32>
    %cst_58 = arith.constant 3.200000e+01 : f32
    %226 = vector.broadcast %cst_58 : f32 to vector<16x1xf32>
    %227 = arith.divf %225, %226 : vector<16x1xf32>
    %cst_59 = arith.constant 9.99999974E-6 : f32
    %228 = vector.broadcast %cst_59 : f32 to vector<16x1xf32>
    %229 = arith.addf %227, %228 : vector<16x1xf32>
    %230 = math.rsqrt %229 : vector<16x1xf32>
    %231 = vector.broadcast %230 : vector<16x1xf32> to vector<16x32xf32>
    %232 = arith.mulf %222, %231 : vector<16x32xf32>
    %233 = vector.broadcast %212 : vector<1x32xf32> to vector<16x32xf32>
    %234 = arith.mulf %232, %233 : vector<16x32xf32>
    %235 = vector.broadcast %215 : vector<1x32xf32> to vector<16x32xf32>
    %236 = arith.addf %234, %235 : vector<16x32xf32>
    %237 = arith.truncf %236 : vector<16x32xf32> to vector<16x32xbf16>
    %238 = arith.index_cast %c1_i32 : i32 to index
    %c0_60 = arith.constant 0 : index
    %c0_61 = arith.constant 0 : index
    %239 = vector.load %arg8[%238, %c0_60, %c0_61] : memref<2x32x64xbf16, #tpu.memory_space<vmem>>, vector<1x32x64xbf16>
    %240 = vector.shape_cast %239 : vector<1x32x64xbf16> to vector<32x64xbf16>
    %cst_62 = arith.constant dense<0.000000e+00> : vector<16x64xf32>
    %241 = tpu.matmul %237, %240, %cst_62 {dimension_numbers = #tpu.dot_dimension_numbers<[1], [0], [0], [1], [0, 0, 1, 1], [], []>} : vector<16x32xbf16>, vector<32x64xbf16>, vector<16x64xf32> -> vector<16x64xf32>
    %242 = arith.index_cast %c1_i32 : i32 to index
    %c0_63 = arith.constant 0 : index
    %c0_64 = arith.constant 0 : index
    %243 = vector.load %arg9[%242, %c0_63, %c0_64] : memref<2x1x64xf32, #tpu.memory_space<vmem>>, vector<1x1x64xf32>
    %244 = vector.shape_cast %243 : vector<1x1x64xf32> to vector<1x64xf32>
    %245 = vector.broadcast %244 : vector<1x64xf32> to vector<16x64xf32>
    %246 = arith.addf %241, %245 : vector<16x64xf32>
    %cst_65 = arith.constant 0.000000e+00 : f32
    %247 = vector.broadcast %cst_65 : f32 to vector<16x64xf32>
    %248 = arith.maximumf %246, %247 : vector<16x64xf32>
    %249 = arith.truncf %248 : vector<16x64xf32> to vector<16x64xbf16>
    %250 = arith.index_cast %c1_i32 : i32 to index
    %c0_66 = arith.constant 0 : index
    %c0_67 = arith.constant 0 : index
    %251 = vector.load %arg10[%250, %c0_66, %c0_67] : memref<2x64x32xbf16, #tpu.memory_space<vmem>>, vector<1x64x32xbf16>
    %252 = vector.shape_cast %251 : vector<1x64x32xbf16> to vector<64x32xbf16>
    %cst_68 = arith.constant dense<0.000000e+00> : vector<16x32xf32>
    %253 = tpu.matmul %249, %252, %cst_68 {dimension_numbers = #tpu.dot_dimension_numbers<[1], [0], [0], [1], [0, 0, 1, 1], [], []>} : vector<16x64xbf16>, vector<64x32xbf16>, vector<16x32xf32> -> vector<16x32xf32>
    %254 = arith.index_cast %c1_i32 : i32 to index
    %c0_69 = arith.constant 0 : index
    %c0_70 = arith.constant 0 : index
    %255 = vector.load %arg11[%254, %c0_69, %c0_70] : memref<2x1x32xf32, #tpu.memory_space<vmem>>, vector<1x1x32xf32>
    %256 = vector.shape_cast %255 : vector<1x1x32xf32> to vector<1x32xf32>
    %257 = vector.broadcast %256 : vector<1x32xf32> to vector<16x32xf32>
    %258 = arith.addf %253, %257 : vector<16x32xf32>
    %259 = arith.addf %258, %236 : vector<16x32xf32>
    %cst_71 = arith.constant dense<0.000000e+00> : vector<16xf32>
    %260 = vector.multi_reduction <add>, %259, %cst_71 [1] : vector<16x32xf32> to vector<16xf32>
    %261 = vector.shape_cast %260 : vector<16xf32> to vector<16x1xf32>
    %cst_72 = arith.constant 3.200000e+01 : f32
    %262 = vector.broadcast %cst_72 : f32 to vector<16x1xf32>
    %263 = arith.divf %261, %262 : vector<16x1xf32>
    %264 = vector.broadcast %263 : vector<16x1xf32> to vector<16x32xf32>
    %265 = arith.subf %259, %264 : vector<16x32xf32>
    %266 = arith.mulf %265, %265 : vector<16x32xf32>
    %cst_73 = arith.constant dense<0.000000e+00> : vector<16xf32>
    %267 = vector.multi_reduction <add>, %266, %cst_73 [1] : vector<16x32xf32> to vector<16xf32>
    %268 = vector.shape_cast %267 : vector<16xf32> to vector<16x1xf32>
    %cst_74 = arith.constant 3.200000e+01 : f32
    %269 = vector.broadcast %cst_74 : f32 to vector<16x1xf32>
    %270 = arith.divf %268, %269 : vector<16x1xf32>
    %cst_75 = arith.constant 9.99999974E-6 : f32
    %271 = vector.broadcast %cst_75 : f32 to vector<16x1xf32>
    %272 = arith.addf %270, %271 : vector<16x1xf32>
    %273 = math.rsqrt %272 : vector<16x1xf32>
    %274 = vector.broadcast %273 : vector<16x1xf32> to vector<16x32xf32>
    %275 = arith.mulf %265, %274 : vector<16x32xf32>
    %276 = vector.broadcast %212 : vector<1x32xf32> to vector<16x32xf32>
    %277 = arith.mulf %275, %276 : vector<16x32xf32>
    %278 = vector.broadcast %215 : vector<1x32xf32> to vector<16x32xf32>
    %279 = arith.addf %277, %278 : vector<16x32xf32>
    %c2_i32 = arith.constant 2 : i32
    %c0_76 = arith.constant 0 : index
    %c0_77 = arith.constant 0 : index
    %280 = vector.load %arg12[%c0_76, %c0_77] : memref<16x32xf32, #tpu.memory_space<vmem>>, vector<16x32xf32>
    tpu.vector_store %arg12[%c0_76, %c0_77], %279 {strides = array<i32>} : memref<16x32xf32, #tpu.memory_space<vmem>>, vector<16x32xf32>,
    return
  }
  func.func @transform_0(%arg0: i32, %arg1: i32) -> (i32, i32) {
    %c0_i32 = arith.constant 0 : i32
    %c0_i32_0 = arith.constant 0 : i32
    return %arg0, %c0_i32 : i32, i32
  }
  func.func @transform_1(%arg0: i32, %arg1: i32) -> (i32, i32, i32) {
    %c0_i32 = arith.constant 0 : i32
    %c0_i32_0 = arith.constant 0 : i32
    %c0_i32_1 = arith.constant 0 : i32
    return %arg1, %c0_i32, %c0_i32_0 : i32, i32, i32
  }
  func.func @transform_2(%arg0: i32, %arg1: i32) -> (i32, i32, i32) {
    %c0_i32 = arith.constant 0 : i32
    %c0_i32_0 = arith.constant 0 : i32
    %c0_i32_1 = arith.constant 0 : i32
    return %arg1, %c0_i32, %c0_i32_0 : i32, i32, i32
  }
  func.func @transform_3(%arg0: i32, %arg1: i32) -> (i32, i32, i32) {
    %c0_i32 = arith.constant 0 : i32
    %c0_i32_0 = arith.constant 0 : i32
    %c0_i32_1 = arith.constant 0 : i32
    return %arg1, %c0_i32, %c0_i32_0 : i32, i32, i32
  }
  func.func @transform_4(%arg0: i32, %arg1: i32) -> (i32, i32, i32) {
    %c0_i32 = arith.constant 0 : i32
    %c0_i32_0 = arith.constant 0 : i32
    %c0_i32_1 = arith.constant 0 : i32
    return %arg1, %c0_i32, %c0_i32_0 : i32, i32, i32
  }
  func.func @transform_5(%arg0: i32, %arg1: i32) -> (i32, i32, i32) {
    %c0_i32 = arith.constant 0 : i32
    %c0_i32_0 = arith.constant 0 : i32
    %c0_i32_1 = arith.constant 0 : i32
    return %arg1, %c0_i32, %c0_i32_0 : i32, i32, i32
  }
  func.func @transform_6(%arg0: i32, %arg1: i32) -> (i32, i32, i32) {
    %c0_i32 = arith.constant 0 : i32
    %c0_i32_0 = arith.constant 0 : i32
    %c0_i32_1 = arith.constant 0 : i32
    return %arg1, %c0_i32, %c0_i32_0 : i32, i32, i32
  }
  func.func @transform_7(%arg0: i32, %arg1: i32) -> (i32, i32, i32) {
    %c0_i32 = arith.constant 0 : i32
    %c0_i32_0 = arith.constant 0 : i32
    %c0_i32_1 = arith.constant 0 : i32
    return %arg1, %c0_i32, %c0_i32_0 : i32, i32, i32
  }
  func.func @transform_8(%arg0: i32, %arg1: i32) -> (i32, i32, i32) {
    %c0_i32 = arith.constant 0 : i32
    %c0_i32_0 = arith.constant 0 : i32
    %c0_i32_1 = arith.constant 0 : i32
    return %arg1, %c0_i32, %c0_i32_0 : i32, i32, i32
  }
  func.func @transform_9(%arg0: i32, %arg1: i32) -> (i32, i32, i32) {
    %c0_i32 = arith.constant 0 : i32
    %c0_i32_0 = arith.constant 0 : i32
    %c0_i32_1 = arith.constant 0 : i32
    return %arg1, %c0_i32, %c0_i32_0 : i32, i32, i32
  }
  func.func @transform_10(%arg0: i32, %arg1: i32) -> (i32, i32) {
    %c0_i32 = arith.constant 0 : i32
    %c0_i32_0 = arith.constant 0 : i32
    return %arg0, %c0_i32 : i32, i32
  }
}

</mosaic_0001>

<bundles_post_ra>
// kernel: tpu_custom_call.1
= control target key start
LH: loop header
LB: loop body
LE: loop exit
PB: predicated region body
PF: predicated region fallthrough
CT: control target
= control target key end

     0   :  { %15 = vsyncpa [#allocation3], 0  ;;  %s3983_s0 = inlined_call_operand.hbm [shape: f32[16,32], index: 0, kind: input, shape index: {}]   ;;  %s3984_s1 = inlined_call_operand.vmem [shape: bf16[2,32,96], index: 1, kind: input, shape index: {}]   ;;  %s3985_s2 = inlined_call_operand.vmem [shape: bf16[2,32,32], index: 2, kind: input, shape index: {}]   ;;  %s3986_s3 = inlined_call_operand.vmem [shape: f32[2,1,32], index: 3, kind: input, shape index: {}]   ;;  %s3987_s4 = inlined_call_operand.vmem [shape: f32[2,1,32], index: 4, kind: input, shape index: {}]   ;;  %s3988_s5 = inlined_call_operand.vmem [shape: f32[2,1,32], index: 5, kind: input, shape index: {}]   ;;  %s3989_s6 = inlined_call_operand.vmem [shape: bf16[2,32,64], index: 6, kind: input, shape index: {}]   ;;  %s3990_s7 = inlined_call_operand.vmem [shape: f32[2,1,64], index: 7, kind: input, shape index: {}]   ;;  %s3991_s8 = inlined_call_operand.vmem [shape: bf16[2,64,32], index: 8, kind: input, shape index: {}]   ;;  %s3992_s9 = inlined_call_operand.vmem [shape: f32[2,1,32], index: 9, kind: input, shape index: {}]   ;;  %s3993_s10 = inlined_call_operand.hbm [shape: f32[16,32], index: 10, kind: output, shape index: {}]  }
   0x1   :  { %16 = vsyncpa [#allocation4], 0  ;;  %s3329_s13 = smov [#allocation2]   ;;  %s3281_s17 = scalar_lea.hbm %s3983_s0, 256 }
   0x2   :  { %s22_s14 = sshll.u32 %s3329_s13, 4  ;;  %p3282_p0 = scmp.ne.s32.totalorder %s3983_s0, %s3281_s17  ;;  %s23_s14 = int_to_ptr.vmem [resolvable:$true] %s22_s14 }
   0x3   :  { %p3285_p1 = scmp.lt.u32.totalorder %s3281_s17, %s3983_s0 }
   0x5   :  { %p3287_p2 = pnand %p3285_p1, %p3282_p0 }
   0x7   :  { %3290 = shalt.err (!%p3287_p2)
}
   0x8   :  { %s3291_s22 = scalar_lea.vmem %s23_s14, 256  ;;  %p3296_p4 = scmp.lt.s32.totalorder %s23_s14, %s23_s14 }
   0x9   :  { %p3292_p3 = scmp.ne.s32.totalorder %s23_s14, %s3291_s22  ;;  %p3297_p5 = scmp.lt.s32.totalorder %s3291_s22, %s3291_s22 }
   0xb   :  { %p3298_p6 = por %p3297_p5, %p3296_p4 }
   0xd   :  { %p3299_p7 = pnand %p3298_p6, %p3292_p3 }
   0xf   :  { %3302 = shalt.err (!%p3299_p7)
}
  0x10   :  { %s3330_s23 = smov 128   ;;  %s3331_s24 = smov 8  }
  0x11   :  { %28 = dma.hbm_to_vmem [thread:$0]  %s3983_s0, 256, %s23_s14, [#allocation3], %s3330_s23, %s3330_s23, %s3331_s24  }
  0x12   :  { %3325 = dma.done.wait [#allocation3], 256  }
  0x13   :  { %3326 = vsyncadd [#allocation3], 4294967040  ;;  %v3332_v0 = vmov 0.0   ;;  %vm3333_vm0 = vmmov 0   ;;  %v3181_v1 = vld [vmem:[%s3984_s1] sm:$0xff]   ;;  %vm57_vm1 = vcmask 261120  }
  0x14   :  { %2874 = vmatprep.subr.bf16.mxu1 %v3332_v0  ;;  %2878 = vmatprep.mubr.msk.bf16.mxu1 %vm3333_vm0, %v3332_v0  ;;  %v3182_v2 = vld [vmem:[%s3984_s1 + $0x8] sm:$0xff]   ;;  %v55_v3 = vld [vmem:[#allocation2] sm:$0xff]  ;;  %s3334_s30 = smov 112   ;;  %s3335_s11 = smov 120   ;;  %vm146_vm2 = vcmask 64512   ;;  %vm654_vm3 = vcmask 1043456  }
  0x15   :  { %2888 = vmatprep.subr.bf16.mxu0 %v3332_v0  ;;  %2890 = vmatprep.mubr.msk.bf16.mxu0 %vm3333_vm0, %v3332_v0  ;;  %v56_v4 = vld [vmem:[#allocation2 + $0x8] sm:$0xff]  ;;  %58 = vst.msk [vmem:[#allocation5] sm:$0xff] %vm57_vm1, %v55_v3  ;;  %s3336_s12 = smov 104   ;;  %s3337_s13 = smov 96   ;;  %vm1046_vm4 = vcmask 130048   ;;  %vm1049_vm5 = vcmask 195584  }
  0x16   :  { %2875 = vmatpush3.bf16.msra.mxu1 %v3181_v1  ;;  %59 = vst.msk [vmem:[#allocation5 + $0x8] sm:$0xff] %vm57_vm1, %v56_v4  ;;  %s3338_s14 = smov 64   ;;  %s3339_s19 = smov 16   ;;  %vm1277_vm6 = vcmask 523264  }
  0x17   :  { %2876 = vmatprep.subr.bf16.mxu1 %v3332_v0  ;;  %s3340_s20 = smov 24  }
  0x1a   :  { %2877 = vmatpush3.bf16.msra.mxu1 %v3182_v2 }
  0x1b   :  { %2882 = vmatprep.subr.bf16.mxu1 %v3332_v0 }
  0x1c   :  { %v3428_v5 = vld [vmem:[#allocation5] sm:$0xff] }
  0x1d   :  { %v3430_v6 = vld [vmem:[#allocation5 + $0x8] sm:$0xff] }
  0x1e   :  { %v62_v7 = vpack.c.bf16 %v3430_v6, %v3428_v5 }
  0x20   :  { %2879 = vmatmul.mubr.msk.bf16.vlgmr.msra.gmra.mrb[0].mxu1 %vm57_vm1, %v62_v7 }
  0x21   :  { %2884 = vmatprep.mubr.msk.bf16.mxu1 %vm3333_vm0, %v3332_v0 }
  0xf3   :  { %v117_v8 = vpop.f32.mrb[0].mxu1 }
  0xf4   :  { %v3437_v9 = vpack.c.bf16 %v117_v8, %v117_v8  ;;  %v2880_v10 = vpop.f32.mrb[1].mxu1 }
  0xf5   :  { %v120_v11 = vpop.f32.mrb[2].mxu1 }
  0xf6   :  { %134 = vrot.lane.b32.xlu1 %v3437_v9, %s3334_s30  ;;  %130 = vrot.lane.b32.xlu0 %v3437_v9, %s3335_s11  ;;  %v2881_v12 = vpop.f32.mrb[3].mxu1  ;;  %v3443_v13 = vpack.c.bf16 %v120_v11, %v120_v11  ;;  %v656_v49 = vsel %vm654_vm3, %v3437_v9, 0 }
  0xf8   :  { %v702_v51 = vsel %vm654_vm3, %v3443_v13, 0 }
  0xfa   :  { %136 = vrot.lane.b32.xlu1 %v3443_v13, %s3334_s30  ;;  %132 = vrot.lane.b32.xlu0 %v3443_v13, %s3335_s11 }
  0xfe   :  { %140 = vrot.lane.b32.xlu1 %v3443_v13, %s3336_s12  ;;  %138 = vrot.lane.b32.xlu0 %v3437_v9, %s3336_s12 }
 0x102   :  { %195 = vrot.lane.b32.xlu1 %v3443_v13, %s3337_s13  ;;  %144 = vrot.lane.b32.xlu0 %v3437_v9, %s3337_s13 }
 0x106   :  { %193 = vrot.lane.b32.xlu1 %v3443_v13, %s3338_s14  ;;  %142 = vrot.lane.b32.xlu0 %v3437_v9, %s3338_s14 }
 0x168   :  { %v3461_v14 = vpop.permute.xlu1 %134  ;;  %v3463_v15 = vpop.permute.xlu0 %130 }
 0x169   :  { %v2674_v16 = vcombine.low %v3463_v15, %v3463_v15  ;;  %v2678_v22 = vcombine.low %v3461_v14, %v3461_v14 }
 0x16b   :  { %247 = vrot.lane.b32.xlu0 %v2674_v16, %s3337_s13 }
 0x16c   :  { %v3468_v17 = vpop.permute.xlu1 %136  ;;  %v3470_v18 = vpop.permute.xlu0 %132 }
 0x16d   :  { %v2676_v19 = vcombine.low %v3470_v18, %v3470_v18  ;;  %v2680_v25 = vcombine.low %v3468_v17, %v3468_v17 }
 0x16f   :  { %245 = vrot.lane.b32.xlu0 %v2674_v16, %s3338_s14  ;;  %299 = vrot.lane.b32.xlu1 %v2676_v19, %s3337_s13 }
 0x170   :  { %v3476_v20 = vpop.permute.xlu1 %140  ;;  %v3478_v21 = vpop.permute.xlu0 %138 }
 0x171   :  { %v2682_v28 = vcombine.low %v3478_v21, %v3478_v21  ;;  %v2684_v31 = vcombine.low %v3476_v20, %v3476_v20 }
 0x173   :  { %351 = vrot.lane.b32.xlu0 %v2678_v22, %s3337_s13  ;;  %297 = vrot.lane.b32.xlu1 %v2676_v19, %s3338_s14 }
 0x174   :  { %v196_v23 = vpop.permute.xlu1 %195  ;;  %v145_v24 = vpop.permute.xlu0 %144 }
 0x175   :  { %v151_v26 = vsel %vm146_vm2, %v145_v24, 0  ;;  %v201_v27 = vsel %vm146_vm2, %v196_v23, 0 }
 0x176   :  { %2883 = vmatpush3.bf16.xpose.msra.mxu1 %v151_v26  ;;  %2889 = vmatpush3.bf16.xpose.msra.mxu0 %v201_v27 }
 0x177   :  { %349 = vrot.lane.b32.xlu0 %v2678_v22, %s3338_s14  ;;  %403 = vrot.lane.b32.xlu1 %v2680_v25, %s3337_s13 }
 0x178   :  { %2894 = vmatprep.subr.bf16.mxu1 %v3332_v0  ;;  %2900 = vmatprep.subr.bf16.mxu0 %v3332_v0  ;;  %v194_v29 = vpop.permute.xlu1 %193  ;;  %v143_v30 = vpop.permute.xlu0 %142 }
 0x17b   :  { %401 = vrot.lane.b32.xlu1 %v2680_v25, %s3338_s14  ;;  %455 = vrot.lane.b32.xlu0 %v2682_v28, %s3337_s13 }
 0x17d   :  { %2885 = vmatmul.mubr.msk.bf16.vlgmr.msra.gmra.mrb[4].mxu1 %vm146_vm2, %v143_v30  ;;  %2891 = vmatmul.mubr.msk.bf16.vlgmr.msra.gmra.mrb[0].mxu0 %vm146_vm2, %v194_v29 }
 0x17e   :  { %2896 = vmatprep.mubr.msk.bf16.mxu1 %vm3333_vm0, %v3332_v0  ;;  %2902 = vmatprep.mubr.msk.bf16.mxu0 %vm3333_vm0, %v3332_v0 }
 0x17f   :  { %507 = vrot.lane.b32.xlu1 %v2684_v31, %s3337_s13  ;;  %453 = vrot.lane.b32.xlu0 %v2682_v28, %s3338_s14 }
 0x183   :  { %505 = vrot.lane.b32.xlu1 %v2684_v31, %s3338_s14 }
 0x1dd   :  { %v248_v32 = vpop.permute.xlu0 %247 }
 0x1de   :  { %v253_v33 = vsel %vm146_vm2, %v248_v32, 0 }
 0x1df   :  { %2895 = vmatpush3.bf16.xpose.msra.mxu1 %v253_v33 }
 0x1e0   :  { %2906 = vmatprep.subr.bf16.mxu1 %v3332_v0 }
 0x1e1   :  { %v300_v34 = vpop.permute.xlu1 %299  ;;  %v246_v35 = vpop.permute.xlu0 %245 }
 0x1e2   :  { %v305_v36 = vsel %vm146_vm2, %v300_v34, 0 }
 0x1e3   :  { %2901 = vmatpush3.bf16.xpose.msra.mxu0 %v305_v36 }
 0x1e4   :  { %2912 = vmatprep.subr.bf16.mxu0 %v3332_v0 }
 0x1e5   :  { %v298_v37 = vpop.permute.xlu1 %297  ;;  %v352_v38 = vpop.permute.xlu0 %351 }
 0x1e6   :  { %v357_v39 = vsel %vm146_vm2, %v352_v38, 0  ;;  %2897 = vmatmul.mubr.msk.bf16.vlgmr.msra.gmra.mrb[8].mxu1 %vm146_vm2, %v246_v35 }
 0x1e7   :  { %2907 = vmatpush3.bf16.xpose.msra.mxu1 %v357_v39  ;;  %2908 = vmatprep.mubr.msk.bf16.mxu1 %vm3333_vm0, %v3332_v0 }
 0x1e8   :  { %2918 = vmatprep.subr.bf16.mxu1 %v3332_v0 }
 0x1e9   :  { %v404_v40 = vpop.permute.xlu1 %403  ;;  %v350_v41 = vpop.permute.xlu0 %349 }
 0x1ea   :  { %v409_v42 = vsel %vm146_vm2, %v404_v40, 0  ;;  %2903 = vmatmul.mubr.msk.bf16.vlgmr.msra.gmra.mrb[4].mxu0 %vm146_vm2, %v298_v37 }
 0x1eb   :  { %2913 = vmatpush3.bf16.xpose.msra.mxu0 %v409_v42  ;;  %2914 = vmatprep.mubr.msk.bf16.mxu0 %vm3333_vm0, %v3332_v0 }
 0x1ec   :  { %2924 = vmatprep.subr.bf16.mxu0 %v3332_v0 }
 0x1ed   :  { %v402_v43 = vpop.permute.xlu1 %401  ;;  %v456_v44 = vpop.permute.xlu0 %455 }
 0x1ee   :  { %v461_v45 = vsel %vm146_vm2, %v456_v44, 0  ;;  %2909 = vmatmul.mubr.msk.bf16.vlgmr.msra.gmra.mrb[12].mxu1 %vm146_vm2, %v350_v41 }
 0x1ef   :  { %2919 = vmatpush3.bf16.xpose.msra.mxu1 %v461_v45  ;;  %2920 = vmatprep.mubr.msk.bf16.mxu1 %vm3333_vm0, %v3332_v0 }
 0x1f0   :  { %2930 = vmatprep.subr.bf16.mxu1 %v3332_v0 }
 0x1f1   :  { %v508_v46 = vpop.permute.xlu1 %507  ;;  %v454_v48 = vpop.permute.xlu0 %453 }
 0x1f2   :  { %v513_v47 = vsel %vm146_vm2, %v508_v46, 0  ;;  %2915 = vmatmul.mubr.msk.bf16.vlgmr.msra.gmra.mrb[8].mxu0 %vm146_vm2, %v402_v43 }
 0x1f3   :  { %2925 = vmatpush3.bf16.xpose.msra.mxu0 %v513_v47  ;;  %2926 = vmatprep.mubr.msk.bf16.mxu0 %vm3333_vm0, %v3332_v0 }
 0x1f4   :  { %2936 = vmatprep.subr.bf16.mxu0 %v3332_v0 }
 0x1f5   :  { %v506_v50 = vpop.permute.xlu1 %505 }
 0x1f6   :  { %2921 = vmatmul.mubr.msk.bf16.vlgmr.msra.gmra.mrb[16].mxu1 %vm146_vm2, %v454_v48 }
 0x1f7   :  { %2931 = vmatpush3.bf16.msra.mxu1 %v656_v49  ;;  %2932 = vmatprep.mubr.msk.bf16.mxu1 %vm3333_vm0, %v3332_v0 }
 0x1f8   :  { %2942 = vmatprep.subr.bf16.mxu1 %v3332_v0 }
 0x1fa   :  { %2927 = vmatmul.mubr.msk.bf16.vlgmr.msra.gmra.mrb[12].mxu0 %vm146_vm2, %v506_v50 }
 0x1fb   :  { %2937 = vmatpush3.bf16.msra.mxu0 %v702_v51  ;;  %2938 = vmatprep.mubr.msk.bf16.mxu0 %vm3333_vm0, %v3332_v0 }
 0x1fc   :  { %2948 = vmatprep.subr.bf16.mxu0 %v3332_v0 }
 0x250   :  { %v187_v52 = vpop.f32.mrb[4].mxu1  ;;  %v237_v53 = vpop.f32.mrb[0].mxu0 }
 0x251   :  { %v2886_v54 = vpop.f32.mrb[5].mxu1  ;;  %v2892_v55 = vpop.f32.mrb[1].mxu0  ;;  %v558_v56 = vsel %vm146_vm2, %v237_v53, -inf  ;;  %v555_v57 = vsel %vm146_vm2, %v187_v52, -inf }
 0x252   :  { %v240_v58 = vpop.f32.mrb[2].mxu0  ;;  %559 = vmax.xlane.f32.xlu1 %v558_v56  ;;  %556 = vmax.xlane.f32.xlu0 %v555_v57  ;;  %v190_v59 = vpop.f32.mrb[6].mxu1 }
 0x253   :  { %v2887_v60 = vpop.f32.mrb[7].mxu1  ;;  %v2893_v61 = vpop.f32.mrb[3].mxu0 }
 0x2b9   :  { %v289_v62 = vpop.f32.mrb[8].mxu1 }
 0x2ba   :  { %v2898_v63 = vpop.f32.mrb[9].mxu1  ;;  %v561_v1 = vsel %vm146_vm2, %v289_v62, -inf }
 0x2bb   :  { %562 = vmax.xlane.f32.xlu0 %v561_v1  ;;  %v292_v2 = vpop.f32.mrb[10].mxu1 }
 0x2bc   :  { %v2899_v3 = vpop.f32.mrb[11].mxu1 }
 0x2bd   :  { %v341_v4 = vpop.f32.mrb[4].mxu0 }
 0x2be   :  { %v2904_v7 = vpop.f32.mrb[5].mxu0  ;;  %v564_v8 = vsel %vm146_vm2, %v341_v4, -inf }
 0x2bf   :  { %v344_v9 = vpop.f32.mrb[6].mxu0  ;;  %565 = vmax.xlane.f32.xlu0 %v564_v8 }
 0x2c0   :  { %v2905_v10 = vpop.f32.mrb[7].mxu0 }
 0x2c1   :  { %v393_v11 = vpop.f32.mrb[12].mxu1 }
 0x2c2   :  { %v2910_v12 = vpop.f32.mrb[13].mxu1  ;;  %v567_v13 = vsel %vm146_vm2, %v393_v11, -inf }
 0x2c3   :  { %568 = vmax.xlane.f32.xlu1 %v567_v13  ;;  %v396_v16 = vpop.f32.mrb[14].mxu1 }
 0x2c4   :  { %v2911_v19 = vpop.f32.mrb[15].mxu1 }
 0x2c5   :  { %v445_v22 = vpop.f32.mrb[8].mxu0 }
 0x2c6   :  { %v2916_v23 = vpop.f32.mrb[9].mxu0  ;;  %v570_v24 = vsel %vm146_vm2, %v445_v22, -inf }
 0x2c7   :  { %v448_v25 = vpop.f32.mrb[10].mxu0  ;;  %571 = vmax.xlane.f32.xlu0 %v570_v24 }
 0x2c8   :  { %v2917_v26 = vpop.f32.mrb[11].mxu0 }
 0x2c9   :  { %v497_v27 = vpop.f32.mrb[16].mxu1 }
 0x2ca   :  { %v2922_v28 = vpop.f32.mrb[17].mxu1  ;;  %v573_v29 = vsel %vm146_vm2, %v497_v27, -inf }
 0x2cb   :  { %574 = vmax.xlane.f32.xlu1 %v573_v29  ;;  %v500_v30 = vpop.f32.mrb[18].mxu1 }
 0x2cc   :  { %v2923_v31 = vpop.f32.mrb[19].mxu1  ;;  %v794_v30 = vsel %vm654_vm3, %v3470_v18, 0 }
 0x2cd   :  { %v549_v32 = vpop.f32.mrb[12].mxu0  ;;  %v748_v31 = vsel %vm654_vm3, %v3463_v15, 0 }
 0x2ce   :  { %v2928_v33 = vpop.f32.mrb[13].mxu0  ;;  %v576_v34 = vsel %vm146_vm2, %v549_v32, -inf }
 0x2cf   :  { %v552_v35 = vpop.f32.mrb[14].mxu0  ;;  %577 = vmax.xlane.f32.xlu0 %v576_v34 }
 0x2d0   :  { %v2929_v36 = vpop.f32.mrb[15].mxu0 }
 0x2df   :  { %v560_v37 = vpop.xlane.xlu1 %559  ;;  %v557_v38 = vpop.xlane.xlu0 %556 }
 0x2e0   :  { %v580_v39 = vsub.f32 %v237_v53, %v560_v37  ;;  %v579_v40 = vsub.f32 %v187_v52, %v557_v38  ;;  %v840_v38 = vsel %vm654_vm3, %v3461_v14, 0 }
 0x2e2   :  { %v589_v41 = vmul.f32 1.442695, %v580_v39  ;;  %v587_v42 = vmul.f32 1.442695, %v579_v40 }
 0x2e4   :  { %3201 = vpow2.f32 %v589_v41 }
 0x2e5   :  { %3203 = vpow2.f32 %v587_v42 }
 0x2ee   :  { %v3202_v43 = vpop.eup %3201 }
 0x2ef   :  { %v3204_v44 = vpop.eup %3203  ;;  %v606_v45 = vsel %vm146_vm2, %v3202_v43, 0.0 }
 0x2f0   :  { %607 = vadd.xlane.f32.xlu0 %v606_v45  ;;  %v603_v46 = vsel %vm146_vm2, %v3204_v44, 0.0 }
 0x2f1   :  { %604 = vadd.xlane.f32.xlu1 %v603_v46 }
 0x348   :  { %v563_v47 = vpop.xlane.xlu0 %562 }
 0x349   :  { %v581_v48 = vsub.f32 %v289_v62, %v563_v47  ;;  %v932_v47 = vsel %vm654_vm3, %v3478_v21, 0 }
 0x34b   :  { %v591_v49 = vmul.f32 1.442695, %v581_v48 }
 0x34c   :  { %v566_v50 = vpop.xlane.xlu0 %565 }
 0x34d   :  { %3205 = vpow2.f32 %v591_v49  ;;  %v582_v51 = vsub.f32 %v341_v4, %v566_v50  ;;  %v978_v50 = vsel %vm654_vm3, %v3476_v20, 0 }
 0x34f   :  { %v593_v53 = vmul.f32 1.442695, %v582_v51 }
 0x350   :  { %v569_v52 = vpop.xlane.xlu1 %568 }
 0x351   :  { %3207 = vpow2.f32 %v593_v53  ;;  %v583_v54 = vsub.f32 %v393_v11, %v569_v52 }
 0x353   :  { %v595_v55 = vmul.f32 1.442695, %v583_v54 }
 0x354   :  { %v572_v56 = vpop.xlane.xlu0 %571 }
 0x355   :  { %3209 = vpow2.f32 %v595_v55  ;;  %v584_v57 = vsub.f32 %v445_v22, %v572_v56 }
 0x357   :  { %v3206_v58 = vpop.eup %3205  ;;  %v597_v59 = vmul.f32 1.442695, %v584_v57 }
 0x358   :  { %v575_v60 = vpop.xlane.xlu1 %574  ;;  %v609_v61 = vsel %vm146_vm2, %v3206_v58, 0.0 }
 0x359   :  { %3211 = vpow2.f32 %v597_v59  ;;  %v585_v63 = vsub.f32 %v497_v27, %v575_v60  ;;  %610 = vadd.xlane.f32.xlu1 %v609_v61 }
 0x35b   :  { %v3208_v62 = vpop.eup %3207  ;;  %v599_v1 = vmul.f32 1.442695, %v585_v63 }
 0x35c   :  { %v578_v2 = vpop.xlane.xlu0 %577  ;;  %v612_v3 = vsel %vm146_vm2, %v3208_v62, 0.0 }
 0x35d   :  { %3213 = vpow2.f32 %v599_v1  ;;  %v586_v4 = vsub.f32 %v549_v32, %v578_v2  ;;  %613 = vadd.xlane.f32.xlu0 %v612_v3 }
 0x35f   :  { %v3210_v7 = vpop.eup %3209  ;;  %v601_v8 = vmul.f32 1.442695, %v586_v4  ;;  %v3183_v4 = vld [vmem:[%s3985_s2] sm:$0xff]  }
 0x360   :  { %v615_v9 = vsel %vm146_vm2, %v3210_v7, 0.0 }
 0x361   :  { %3215 = vpow2.f32 %v601_v8  ;;  %616 = vadd.xlane.f32.xlu1 %v615_v9 }
 0x363   :  { %v3212_v10 = vpop.eup %3211 }
 0x364   :  { %v618_v11 = vsel %vm146_vm2, %v3212_v10, 0.0 }
 0x365   :  { %619 = vadd.xlane.f32.xlu0 %v618_v11 }
 0x367   :  { %v3557_v12 = vpop.eup %3213 }
 0x368   :  { %v621_v13 = vsel %vm146_vm2, %v3557_v12, 0.0 }
 0x369   :  { %622 = vadd.xlane.f32.xlu1 %v621_v13 }
 0x36b   :  { %v3561_v16 = vpop.eup %3215 }
 0x36c   :  { %v624_v19 = vsel %vm146_vm2, %v3561_v16, 0.0 }
 0x36d   :  { %625 = vadd.xlane.f32.xlu0 %v624_v19 }
 0x37d   :  { %v608_v22 = vpop.xlane.xlu0 %607 }
 0x37e   :  { %3217 = vrcp.f32 %v608_v22  ;;  %v605_v23 = vpop.xlane.xlu1 %604  ;;  %v3184_v22 = vld [vmem:[%s3985_s2 + $0x8] sm:$0xff]  }
 0x37f   :  { %3219 = vrcp.f32 %v605_v23 }
 0x388   :  { %v3218_v24 = vpop.eup %3217 }
 0x389   :  { %v3220_v25 = vpop.eup %3219  ;;  %v636_v26 = vmul.f32 %v3218_v24, %v3202_v43  ;;  %v886_v43 = vsel %vm654_vm3, %v3468_v17, 0 }
 0x38a   :  { %v635_v27 = vmul.f32 %v3220_v25, %v3204_v44 }
 0x38b   :  { %v644_v28 = vpack.c.bf16 %v636_v26, %v636_v26 }
 0x38c   :  { %v643_v29 = vpack.c.bf16 %v635_v27, %v635_v27 }
 0x38d   :  { %2939 = vmatmul.mubr.msk.bf16.vlgmr.msra.gmra.mrb[16].mxu0 %vm146_vm2, %v644_v28 }
 0x38e   :  { %2933 = vmatmul.mubr.msk.bf16.vlgmr.msra.gmra.mrb[20].mxu1 %vm146_vm2, %v643_v29  ;;  %2949 = vmatpush3.bf16.msra.mxu0 %v794_v30 }
 0x38f   :  { %2943 = vmatpush3.bf16.msra.mxu1 %v748_v31  ;;  %2944 = vmatprep.mubr.msk.bf16.mxu1 %vm3333_vm0, %v3332_v0 }
 0x390   :  { %2954 = vmatprep.subr.bf16.mxu1 %v3332_v0  ;;  %2950 = vmatprep.mubr.msk.bf16.mxu0 %vm3333_vm0, %v3332_v0 }
 0x391   :  { %2960 = vmatprep.subr.bf16.mxu0 %v3332_v0 }
 0x3e6   :  { %v611_v18 = vpop.xlane.xlu1 %610 }
 0x3e7   :  { %3221 = vrcp.f32 %v611_v18 }
 0x3ea   :  { %v614_v32 = vpop.xlane.xlu0 %613 }
 0x3eb   :  { %3223 = vrcp.f32 %v614_v32 }
 0x3ee   :  { %v617_v33 = vpop.xlane.xlu1 %616 }
 0x3ef   :  { %3225 = vrcp.f32 %v617_v33 }
 0x3f1   :  { %v3222_v34 = vpop.eup %3221 }
 0x3f2   :  { %v637_v15 = vmul.f32 %v3222_v34, %v3206_v58  ;;  %v620_v35 = vpop.xlane.xlu0 %619 }
 0x3f3   :  { %3227 = vrcp.f32 %v620_v35 }
 0x3f4   :  { %v645_v36 = vpack.c.bf16 %v637_v15, %v637_v15 }
 0x3f5   :  { %v3224_v37 = vpop.eup %3223 }
 0x3f6   :  { %v638_v39 = vmul.f32 %v3224_v37, %v3208_v62  ;;  %2945 = vmatmul.mubr.msk.bf16.vlgmr.msra.gmra.mrb[24].mxu1 %vm146_vm2, %v645_v36  ;;  %v623_v40 = vpop.xlane.xlu1 %622 }
 0x3f7   :  { %2955 = vmatpush3.bf16.msra.mxu1 %v840_v38  ;;  %3229 = vrcp.f32 %v623_v40  ;;  %2956 = vmatprep.mubr.msk.bf16.mxu1 %vm3333_vm0, %v3332_v0 }
 0x3f8   :  { %v646_v41 = vpack.c.bf16 %v638_v39, %v638_v39  ;;  %2966 = vmatprep.subr.bf16.mxu1 %v3332_v0 }
 0x3f9   :  { %v3226_v42 = vpop.eup %3225 }
 0x3fa   :  { %v639_v44 = vmul.f32 %v3226_v42, %v3210_v7  ;;  %2951 = vmatmul.mubr.msk.bf16.vlgmr.msra.gmra.mrb[20].mxu0 %vm146_vm2, %v646_v41  ;;  %v626_v14 = vpop.xlane.xlu0 %625 }
 0x3fb   :  { %2961 = vmatpush3.bf16.msra.mxu0 %v886_v43  ;;  %3231 = vrcp.f32 %v626_v14  ;;  %2962 = vmatprep.mubr.msk.bf16.mxu0 %vm3333_vm0, %v3332_v0 }
 0x3fc   :  { %v647_v45 = vpack.c.bf16 %v639_v44, %v639_v44  ;;  %2972 = vmatprep.subr.bf16.mxu0 %v3332_v0 }
 0x3fd   :  { %v3228_v46 = vpop.eup %3227 }
 0x3fe   :  { %v640_v48 = vmul.f32 %v3228_v46, %v3212_v10  ;;  %2957 = vmatmul.mubr.msk.bf16.vlgmr.msra.gmra.mrb[28].mxu1 %vm146_vm2, %v647_v45 }
 0x3ff   :  { %2967 = vmatpush3.bf16.msra.mxu1 %v932_v47  ;;  %2968 = vmatprep.mubr.msk.bf16.mxu1 %vm3333_vm0, %v3332_v0 }
 0x400   :  { %v648_v17 = vpack.c.bf16 %v640_v48, %v640_v48  ;;  %2978 = vmatprep.subr.bf16.mxu1 %v3332_v0 }
 0x401   :  { %v3230_v49 = vpop.eup %3229 }
 0x402   :  { %v641_v51 = vmul.f32 %v3230_v49, %v3557_v12  ;;  %2963 = vmatmul.mubr.msk.bf16.vlgmr.msra.gmra.mrb[24].mxu0 %vm146_vm2, %v648_v17  ;;  %v2694_v17 = vld [vmem:[%s3986_s3] ss:$0 sm:$0xff] }
 0x403   :  { %2973 = vmatpush3.bf16.msra.mxu0 %v978_v50  ;;  %2974 = vmatprep.mubr.msk.bf16.mxu0 %vm3333_vm0, %v3332_v0 }
 0x404   :  { %v649_v21 = vpack.c.bf16 %v641_v51, %v641_v51  ;;  %2986 = vmatprep.subr.bf16.mxu0 %v3332_v0 }
 0x405   :  { %v3232_v53 = vpop.eup %3231 }
 0x406   :  { %v642_v52 = vmul.f32 %v3232_v53, %v3561_v16  ;;  %2969 = vmatmul.mubr.msk.bf16.vlgmr.msra.gmra.mrb[32].mxu1 %vm146_vm2, %v649_v21 }
 0x407   :  { %2982 = vmatprep.mubr.msk.bf16.mxu1 %vm3333_vm0, %v3332_v0  ;;  %2979 = vmatpush3.bf16.msra.mxu1 %v3183_v4  ;;  %v3187_v4 = vld [vmem:[%s3991_s8] sm:$0xff]  }
 0x408   :  { %v650_v20 = vpack.c.bf16 %v642_v52, %v642_v52  ;;  %2980 = vmatprep.subr.bf16.mxu1 %v3332_v0 }
 0x40a   :  { %2975 = vmatmul.mubr.msk.bf16.vlgmr.msra.gmra.mrb[28].mxu0 %vm146_vm2, %v650_v20 }
 0x40b   :  { %2990 = vmatprep.mubr.msk.bf16.mxu0 %vm3333_vm0, %v3332_v0  ;;  %2981 = vmatpush3.bf16.msra.mxu1 %v3184_v22 }
 0x40c   :  { %2994 = vmatprep.subr.bf16.mxu1 %v3332_v0 }
 0x460   :  { %v738_v54 = vpop.f32.mrb[16].mxu0 }
 0x461   :  { %v692_v55 = vpop.f32.mrb[20].mxu1  ;;  %v2940_v56 = vpop.f32.mrb[17].mxu0 }
 0x462   :  { %v2934_v57 = vpop.f32.mrb[21].mxu1  ;;  %v741_v58 = vpop.f32.mrb[18].mxu0 }
 0x463   :  { %v695_v59 = vpop.f32.mrb[22].mxu1  ;;  %v2941_v60 = vpop.f32.mrb[19].mxu0 }
 0x464   :  { %v2935_v61 = vpop.f32.mrb[23].mxu1 }
 0x4c9   :  { %v784_v63 = vpop.f32.mrb[24].mxu1 }
 0x4ca   :  { %v2946_v62 = vpop.f32.mrb[25].mxu1 }
 0x4cb   :  { %v787_v1 = vpop.f32.mrb[26].mxu1 }
 0x4cc   :  { %v2947_v2 = vpop.f32.mrb[27].mxu1 }
 0x4cd   :  { %v830_v3 = vpop.f32.mrb[20].mxu0 }
 0x4ce   :  { %v3151_v7 = vpack.i.bf16 %v830_v3, %v784_v63  ;;  %v2952_v8 = vpop.f32.mrb[21].mxu0  ;;  %v3186_v3 = vld [vmem:[%s3989_s6 + $0x8] sm:$0xff]  }
 0x4cf   :  { %v833_v9 = vpop.f32.mrb[22].mxu0 }
 0x4d0   :  { %v2953_v10 = vpop.f32.mrb[23].mxu0  ;;  %3152 = vrot.lane.b32.xlu1 %v3151_v7, %s3331_s24  ;;  %v3188_v7 = vld [vmem:[%s3991_s8 + $0x8] sm:$0xff]  }
 0x4d1   :  { %v876_v11 = vpop.f32.mrb[28].mxu1 }
 0x4d2   :  { %v2958_v12 = vpop.f32.mrb[29].mxu1 }
 0x4d3   :  { %v879_v13 = vpop.f32.mrb[30].mxu1 }
 0x4d4   :  { %v2959_v16 = vpop.f32.mrb[31].mxu1 }
 0x4d5   :  { %v922_v19 = vpop.f32.mrb[24].mxu0 }
 0x4d6   :  { %v3156_v23 = vpack.i.bf16 %v922_v19, %v876_v11  ;;  %v2964_v24 = vpop.f32.mrb[25].mxu0  ;;  %v3657_v19 = vld [vmem:[%s3987_s4] ss:$0 sm:$0xff] }
 0x4d7   :  { %v925_v25 = vpop.f32.mrb[26].mxu0 }
 0x4d8   :  { %v2965_v26 = vpop.f32.mrb[27].mxu0  ;;  %3157 = vrot.lane.b32.xlu0 %v3156_v23, %s3339_s19 }
 0x4d9   :  { %v968_v27 = vpop.f32.mrb[32].mxu1  ;;  %v3663_v26 = vld [vmem:[%s3988_s5] ss:$0 sm:$0xff] }
 0x4da   :  { %v2970_v28 = vpop.f32.mrb[33].mxu1 }
 0x4db   :  { %v971_v29 = vpop.f32.mrb[34].mxu1 }
 0x4dc   :  { %v2971_v30 = vpop.f32.mrb[35].mxu1 }
 0x4dd   :  { %v1014_v31 = vpop.f32.mrb[28].mxu0 }
 0x4de   :  { %v3161_v18 = vpack.i.bf16 %v1014_v31, %v968_v27  ;;  %v2976_v32 = vpop.f32.mrb[29].mxu0  ;;  %v3189_v31 = vld [vmem:[%s3991_s8 + $0x10] sm:$0xff]  }
 0x4df   :  { %v1017_v33 = vpop.f32.mrb[30].mxu0  ;;  %v2700_v32 = vld [vmem:[%s3990_s7] ss:$0 sm:$0xff] }
 0x4e0   :  { %v2977_v34 = vpop.f32.mrb[31].mxu0  ;;  %3162 = vrot.lane.b32.xlu1 %v3161_v18, %s3340_s20  ;;  %v3190_v18 = vld [vmem:[%s3991_s8 + $0x18] sm:$0xff]  }
 0x542   :  { %v3153_v15 = vpop.permute.xlu1 %3152 }
 0x543   :  { %v3155_v36 = vunpack.i.h.bf16 %v3153_v15  ;;  %v3154_v37 = vunpack.i.l.bf16 %v3153_v15 }
 0x545   :  { %v1045_v41 = vsel %vm146_vm2, %v738_v54, %v3155_v36  ;;  %v1044_v42 = vsel %vm146_vm2, %v692_v55, %v3154_v37 }
 0x54a   :  { %v3158_v35 = vpop.permute.xlu0 %3157 }
 0x54b   :  { %v3160_v38 = vunpack.i.h.bf16 %v3158_v35  ;;  %v3159_v39 = vunpack.i.l.bf16 %v3158_v35 }
 0x54d   :  { %v1048_v14 = vsel %vm1046_vm4, %v1045_v41, %v3160_v38  ;;  %v1047_v45 = vsel %vm1046_vm4, %v1044_v42, %v3159_v39  ;;  %v2704_v41 = vld [vmem:[%s3992_s9] ss:$0 sm:$0xff] }
 0x552   :  { %v3163_v40 = vpop.permute.xlu1 %3162 }
 0x553   :  { %v3165_v43 = vunpack.i.h.bf16 %v3163_v40  ;;  %v3164_v44 = vunpack.i.l.bf16 %v3163_v40 }
 0x555   :  { %v1051_v46 = vsel %vm1049_vm5, %v1048_v14, %v3165_v43  ;;  %v1050_v47 = vsel %vm1049_vm5, %v1047_v45, %v3164_v44 }
 0x556   :  { %v1052_v48 = vpack.c.bf16 %v1051_v46, %v1050_v47 }
 0x558   :  { %2983 = vmatmul.mubr.msk.bf16.vlgmr.msra.gmra.mrb[36].mxu1 %vm57_vm1, %v1052_v48 }
 0x559   :  { %3002 = vmatprep.mubr.msk.bf16.mxu1 %vm3333_vm0, %v3332_v0  ;;  %2995 = vmatpush3.bf16.msra.mxu1 %v3187_v4 }
 0x55a   :  { %2996 = vmatprep.subr.bf16.mxu1 %v3332_v0 }
 0x55d   :  { %2997 = vmatpush3.bf16.msra.mxu1 %v3188_v7 }
 0x55e   :  { %2998 = vmatprep.subr.bf16.mxu1 %v3332_v0 }
 0x561   :  { %2999 = vmatpush3.bf16.msra.mxu1 %v3189_v31 }
 0x562   :  { %3000 = vmatprep.subr.bf16.mxu1 %v3332_v0 }
 0x565   :  { %3001 = vmatpush3.bf16.msra.mxu1 %v3190_v18 }
 0x566   :  { %3020 = vmatprep.subr.bf16.mxu1 %v3332_v0 }
 0x62b   :  { %v1113_v49 = vpop.f32.mrb[36].mxu1 }
 0x62c   :  { %v1114_v50 = vadd.f32 %v2694_v17, %v1113_v49  ;;  %v2984_v51 = vpop.f32.mrb[37].mxu1 }
 0x62d   :  { %v1116_v21 = vpop.f32.mrb[38].mxu1 }
 0x62e   :  { %v1117_v53 = vadd.f32 %v2694_v17, %v1116_v21  ;;  %v2985_v52 = vpop.f32.mrb[39].mxu1  ;;  %v1122_v20 = vadd.f32 %v1114_v50, %v3428_v5 }
 0x630   :  { %v1124_v54 = vsel %vm57_vm1, %v1122_v20, 0.0  ;;  %v1123_v55 = vadd.f32 %v1117_v53, %v3430_v6  ;;  %v3185_v6 = vld [vmem:[%s3989_s6] sm:$0xff]  }
 0x631   :  { %1125 = vadd.xlane.f32.xlu1 %v1124_v54  ;;  %2987 = vmatpush3.bf16.msra.mxu0 %v3185_v6 }
 0x632   :  { %v1127_v56 = vsel %vm57_vm1, %v1123_v55, 0.0  ;;  %2988 = vmatprep.subr.bf16.mxu0 %v3332_v0 }
 0x633   :  { %1128 = vadd.xlane.f32.xlu0 %v1127_v56 }
 0x635   :  { %2989 = vmatpush3.bf16.msra.mxu0 %v3186_v3 }
 0x636   :  { %3006 = vmatprep.subr.bf16.mxu0 %v3332_v0 }
 0x6be   :  { %v1126_v57 = vpop.xlane.xlu1 %1125 }
 0x6bf   :  { %v1131_v58 = vmul.f32 0.03125, %v1126_v57 }
 0x6c0   :  { %v1129_v59 = vpop.xlane.xlu0 %1128 }
 0x6c1   :  { %v1133_v60 = vsub.f32 %v1122_v20, %v1131_v58  ;;  %v1132_v61 = vmul.f32 0.03125, %v1129_v59  ;;  %v3191_v58 = vld [vmem:[%s3984_s1 + $0x10] sm:$0xff]   ;;  %v3192_v59 = vld [vmem:[%s3984_s1 + $0x18] sm:$0xff]  }
 0x6c3   :  { %v1134_v63 = vsub.f32 %v1123_v55, %v1132_v61  ;;  %v1135_v62 = vmul.f32 %v1133_v60, %v1133_v60 }
 0x6c5   :  { %v1137_v1 = vsel %vm57_vm1, %v1135_v62, 0.0  ;;  %v1136_v2 = vmul.f32 %v1134_v63, %v1134_v63 }
 0x6c6   :  { %1138 = vadd.xlane.f32.xlu0 %v1137_v1 }
 0x6c7   :  { %v1140_v5 = vsel %vm57_vm1, %v1136_v2, 0.0 }
 0x6c8   :  { %1141 = vadd.xlane.f32.xlu1 %v1140_v5 }
 0x753   :  { %v1139_v8 = vpop.xlane.xlu0 %1138 }
 0x754   :  { %v1143_v9 = vmul.f32 0.03125, %v1139_v8 }
 0x755   :  { %v1142_v10 = vpop.xlane.xlu1 %1141 }
 0x756   :  { %v1145_v11 = vadd.f32 1e-05, %v1143_v9  ;;  %v1144_v12 = vmul.f32 0.03125, %v1142_v10 }
 0x758   :  { %3233 = vrsqrt.f32 %v1145_v11  ;;  %v1146_v13 = vadd.f32 1e-05, %v1144_v12 }
 0x75a   :  { %3235 = vrsqrt.f32 %v1146_v13 }
 0x762   :  { %v3234_v16 = vpop.eup %3233 }
 0x763   :  { %v1149_v22 = vmul.f32 %v3234_v16, %v1133_v60 }
 0x764   :  { %v3236_v23 = vpop.eup %3235 }
 0x765   :  { %v1157_v24 = vmul.f32 %v3657_v19, %v1149_v22  ;;  %v1150_v25 = vmul.f32 %v3236_v23, %v1134_v63 }
 0x767   :  { %v1158_v27 = vmul.f32 %v3657_v19, %v1150_v25  ;;  %v1165_v28 = vadd.f32 %v3663_v26, %v1157_v24 }
 0x769   :  { %v1166_v29 = vadd.f32 %v3663_v26, %v1158_v27 }
 0x76b   :  { %v1167_v30 = vpack.c.bf16 %v1166_v29, %v1165_v28 }
 0x76d   :  { %2991 = vmatmul.mubr.msk.bf16.vlgmr.msra.gmra.mrb[32].mxu0 %vm57_vm1, %v1167_v30 }
 0x76e   :  { %3010 = vmatprep.mubr.msk.bf16.mxu0 %vm3333_vm0, %v3332_v0  ;;  %3007 = vmatpush3.bf16.msra.mxu0 %v3191_v58 }
 0x76f   :  { %3008 = vmatprep.subr.bf16.mxu0 %v3332_v0 }
 0x772   :  { %3009 = vmatpush3.bf16.msra.mxu0 %v3192_v59 }
 0x773   :  { %3014 = vmatprep.subr.bf16.mxu0 %v3332_v0 }
 0x840   :  { %v1228_v33 = vpop.f32.mrb[32].mxu0 }
 0x841   :  { %v1229_v34 = vadd.f32 %v2700_v32, %v1228_v33  ;;  %v2992_v15 = vpop.f32.mrb[33].mxu0 }
 0x842   :  { %v1231_v35 = vpop.f32.mrb[34].mxu0 }
 0x843   :  { %v1232_v36 = vadd.f32 %v2700_v32, %v1231_v35  ;;  %v2993_v37 = vpop.f32.mrb[35].mxu0  ;;  %v1235_v38 = vmax.f32 %v1229_v34, 0.0 }
 0x845   :  { %v1236_v39 = vmax.f32 %v1232_v36, 0.0 }
 0x847   :  { %v1237_v40 = vpack.c.bf16 %v1236_v39, %v1235_v38 }
 0x849   :  { %3003 = vmatmul.mubr.msk.bf16.vlgmr.msra.gmra.mrb[40].mxu1 %vm1277_vm6, %v1237_v40 }
 0x84a   :  { %3022 = vmatprep.mubr.msk.bf16.mxu1 %vm3333_vm0, %v3332_v0 }
 0x91c   :  { %v1315_v42 = vpop.f32.mrb[40].mxu1 }
 0x91d   :  { %v1316_v43 = vadd.f32 %v2704_v41, %v1315_v42  ;;  %v3004_v44 = vpop.f32.mrb[41].mxu1 }
 0x91e   :  { %v1318_v14 = vpop.f32.mrb[42].mxu1 }
 0x91f   :  { %v1319_v45 = vadd.f32 %v2704_v41, %v1318_v14  ;;  %v3005_v46 = vpop.f32.mrb[43].mxu1  ;;  %v1322_v47 = vadd.f32 %v1316_v43, %v1165_v28 }
 0x921   :  { %v1324_v48 = vsel %vm57_vm1, %v1322_v47, 0.0  ;;  %v1323_v17 = vadd.f32 %v1319_v45, %v1166_v29 }
 0x922   :  { %1325 = vadd.xlane.f32.xlu0 %v1324_v48 }
 0x923   :  { %v1327_v49 = vsel %vm57_vm1, %v1323_v17, 0.0 }
 0x924   :  { %1328 = vadd.xlane.f32.xlu1 %v1327_v49 }
 0x9af   :  { %v1326_v50 = vpop.xlane.xlu0 %1325 }
 0x9b0   :  { %v1330_v51 = vmul.f32 0.03125, %v1326_v50 }
 0x9b1   :  { %v1329_v21 = vpop.xlane.xlu1 %1328 }
 0x9b2   :  { %v1332_v53 = vsub.f32 %v1322_v47, %v1330_v51  ;;  %v1331_v52 = vmul.f32 0.03125, %v1329_v21 }
 0x9b4   :  { %v1333_v20 = vsub.f32 %v1323_v17, %v1331_v52  ;;  %v1334_v54 = vmul.f32 %v1332_v53, %v1332_v53 }
 0x9b6   :  { %v1336_v55 = vsel %vm57_vm1, %v1334_v54, 0.0  ;;  %v1335_v56 = vmul.f32 %v1333_v20, %v1333_v20 }
 0x9b7   :  { %1337 = vadd.xlane.f32.xlu0 %v1336_v55 }
 0x9b8   :  { %v1339_v57 = vsel %vm57_vm1, %v1335_v56, 0.0 }
 0x9b9   :  { %1340 = vadd.xlane.f32.xlu1 %v1339_v57 }
 0xa44   :  { %v1338_v60 = vpop.xlane.xlu0 %1337 }
 0xa45   :  { %v1342_v61 = vmul.f32 0.03125, %v1338_v60 }
 0xa46   :  { %v1341_v63 = vpop.xlane.xlu1 %1340 }
 0xa47   :  { %v1344_v62 = vadd.f32 1e-05, %v1342_v61  ;;  %v1343_v1 = vmul.f32 0.03125, %v1341_v63 }
 0xa49   :  { %3237 = vrsqrt.f32 %v1344_v62  ;;  %v1345_v2 = vadd.f32 1e-05, %v1343_v1 }
 0xa4b   :  { %3239 = vrsqrt.f32 %v1345_v2 }
 0xa53   :  { %v3238_v5 = vpop.eup %3237 }
 0xa54   :  { %v1348_v6 = vmul.f32 %v3238_v5, %v1332_v53 }
 0xa55   :  { %v3240_v3 = vpop.eup %3239 }
 0xa56   :  { %v1350_v4 = vmul.f32 %v3657_v19, %v1348_v6  ;;  %v1349_v7 = vmul.f32 %v3240_v3, %v1333_v20 }
 0xa58   :  { %v1351_v8 = vmul.f32 %v3657_v19, %v1349_v7  ;;  %v3703_v9 = vadd.f32 %v3663_v26, %v1350_v4 }
 0xa5a   :  { %v3706_v10 = vadd.f32 %v3663_v26, %v1351_v8 }
 0xa5c   :  { %v1354_v11 = vpack.c.bf16 %v3706_v10, %v3703_v9 }
 0xa5e   :  { %3011 = vmatmul.mubr.msk.bf16.vlgmr.msra.gmra.mrb[36].mxu0 %vm57_vm1, %v1354_v11 }
 0xa5f   :  { %3016 = vmatprep.mubr.msk.bf16.mxu0 %vm3333_vm0, %v3332_v0 }
 0xb31   :  { %v1409_v12 = vpop.f32.mrb[36].mxu0 }
 0xb32   :  { %v3713_v13 = vpack.c.bf16 %v1409_v12, %v1409_v12  ;;  %v3012_v16 = vpop.f32.mrb[37].mxu0 }
 0xb33   :  { %v1412_v22 = vpop.f32.mrb[38].mxu0 }
 0xb34   :  { %v3715_v19 = vpack.c.bf16 %v1412_v22, %v1412_v22  ;;  %1422 = vrot.lane.b32.xlu0 %v3713_v13, %s3335_s11  ;;  %v3013_v23 = vpop.f32.mrb[39].mxu0  ;;  %v1946_v20 = vsel %vm654_vm3, %v3713_v13, 0 }
 0xb36   :  { %1424 = vrot.lane.b32.xlu1 %v3715_v19, %s3335_s11  ;;  %v1992_v55 = vsel %vm654_vm3, %v3715_v19, 0 }
 0xb38   :  { %1428 = vrot.lane.b32.xlu0 %v3715_v19, %s3334_s30 }
 0xb3a   :  { %1426 = vrot.lane.b32.xlu1 %v3713_v13, %s3334_s30 }
 0xb3c   :  { %1432 = vrot.lane.b32.xlu0 %v3715_v19, %s3336_s12 }
 0xb3e   :  { %1430 = vrot.lane.b32.xlu1 %v3713_v13, %s3336_s12 }
 0xb40   :  { %1486 = vrot.lane.b32.xlu0 %v3715_v19, %s3337_s13 }
 0xb42   :  { %1436 = vrot.lane.b32.xlu1 %v3713_v13, %s3337_s13 }
 0xb44   :  { %1484 = vrot.lane.b32.xlu0 %v3715_v19, %s3338_s14 }
 0xb46   :  { %1434 = vrot.lane.b32.xlu1 %v3713_v13, %s3338_s14 }
 0xba6   :  { %v3737_v24 = vpop.permute.xlu0 %1422 }
 0xba7   :  { %v2721_v25 = vcombine.low %v3737_v24, %v3737_v24 }
 0xba8   :  { %v3741_v26 = vpop.permute.xlu1 %1424 }
 0xba9   :  { %v2723_v27 = vcombine.low %v3741_v26, %v3741_v26  ;;  %1538 = vrot.lane.b32.xlu1 %v2721_v25, %s3337_s13 }
 0xbaa   :  { %v3746_v28 = vpop.permute.xlu0 %1428 }
 0xbab   :  { %1590 = vrot.lane.b32.xlu0 %v2723_v27, %s3337_s13  ;;  %v2727_v32 = vcombine.low %v3746_v28, %v3746_v28 }
 0xbac   :  { %v3749_v29 = vpop.permute.xlu1 %1426 }
 0xbad   :  { %1536 = vrot.lane.b32.xlu1 %v2721_v25, %s3338_s14  ;;  %v2725_v31 = vcombine.low %v3749_v29, %v3749_v29 }
 0xbae   :  { %v3752_v30 = vpop.permute.xlu0 %1432 }
 0xbaf   :  { %1588 = vrot.lane.b32.xlu0 %v2723_v27, %s3338_s14  ;;  %v2731_v37 = vcombine.low %v3752_v30, %v3752_v30 }
 0xbb0   :  { %v3757_v18 = vpop.permute.xlu1 %1430 }
 0xbb1   :  { %1642 = vrot.lane.b32.xlu1 %v2725_v31, %s3337_s13  ;;  %v2729_v36 = vcombine.low %v3757_v18, %v3757_v18 }
 0xbb2   :  { %v1487_v33 = vpop.permute.xlu0 %1486 }
 0xbb3   :  { %v1492_v34 = vsel %vm146_vm2, %v1487_v33, 0  ;;  %1694 = vrot.lane.b32.xlu0 %v2727_v32, %s3337_s13 }
 0xbb4   :  { %3021 = vmatpush3.bf16.xpose.msra.mxu1 %v1492_v34  ;;  %v1437_v15 = vpop.permute.xlu1 %1436 }
 0xbb5   :  { %v1442_v35 = vsel %vm146_vm2, %v1437_v15, 0  ;;  %1640 = vrot.lane.b32.xlu1 %v2725_v31, %s3338_s14  ;;  %3032 = vmatprep.subr.bf16.mxu1 %v3332_v0 }
 0xbb6   :  { %3015 = vmatpush3.bf16.xpose.msra.mxu0 %v1442_v35  ;;  %v1485_v38 = vpop.permute.xlu0 %1484 }
 0xbb7   :  { %1692 = vrot.lane.b32.xlu0 %v2727_v32, %s3338_s14  ;;  %3026 = vmatprep.subr.bf16.mxu0 %v3332_v0 }
 0xbb8   :  { %v1435_v39 = vpop.permute.xlu1 %1434 }
 0xbb9   :  { %1746 = vrot.lane.b32.xlu1 %v2729_v36, %s3337_s13 }
 0xbbb   :  { %3023 = vmatmul.mubr.msk.bf16.vlgmr.msra.gmra.mrb[44].mxu1 %vm146_vm2, %v1485_v38  ;;  %1798 = vrot.lane.b32.xlu0 %v2731_v37, %s3337_s13 }
 0xbbc   :  { %3034 = vmatprep.mubr.msk.bf16.mxu1 %vm3333_vm0, %v3332_v0 }
 0xbbd   :  { %1744 = vrot.lane.b32.xlu1 %v2729_v36, %s3338_s14  ;;  %3017 = vmatmul.mubr.msk.bf16.vlgmr.msra.gmra.mrb[40].mxu0 %vm146_vm2, %v1435_v39 }
 0xbbe   :  { %3028 = vmatprep.mubr.msk.bf16.mxu0 %vm3333_vm0, %v3332_v0 }
 0xbbf   :  { %1796 = vrot.lane.b32.xlu0 %v2731_v37, %s3338_s14 }
 0xc1b   :  { %v1539_v40 = vpop.permute.xlu1 %1538 }
 0xc1c   :  { %v1544_v41 = vsel %vm146_vm2, %v1539_v40, 0 }
 0xc1d   :  { %v1591_v42 = vpop.permute.xlu0 %1590  ;;  %3027 = vmatpush3.bf16.xpose.msra.mxu0 %v1544_v41 }
 0xc1e   :  { %v1596_v43 = vsel %vm146_vm2, %v1591_v42, 0  ;;  %3038 = vmatprep.subr.bf16.mxu0 %v3332_v0 }
 0xc1f   :  { %3033 = vmatpush3.bf16.xpose.msra.mxu1 %v1596_v43  ;;  %v1537_v44 = vpop.permute.xlu1 %1536 }
 0xc20   :  { %3044 = vmatprep.subr.bf16.mxu1 %v3332_v0 }
 0xc21   :  { %v1589_v14 = vpop.permute.xlu0 %1588 }
 0xc23   :  { %v1643_v45 = vpop.permute.xlu1 %1642 }
 0xc24   :  { %v1648_v46 = vsel %vm146_vm2, %v1643_v45, 0  ;;  %3029 = vmatmul.mubr.msk.bf16.vlgmr.msra.gmra.mrb[44].mxu0 %vm146_vm2, %v1537_v44 }
 0xc25   :  { %v1695_v47 = vpop.permute.xlu0 %1694  ;;  %3039 = vmatpush3.bf16.xpose.msra.mxu0 %v1648_v46  ;;  %3040 = vmatprep.mubr.msk.bf16.mxu0 %vm3333_vm0, %v3332_v0 }
 0xc26   :  { %v1700_v48 = vsel %vm146_vm2, %v1695_v47, 0  ;;  %3035 = vmatmul.mubr.msk.bf16.vlgmr.msra.gmra.mrb[48].mxu1 %vm146_vm2, %v1589_v14  ;;  %3050 = vmatprep.subr.bf16.mxu0 %v3332_v0 }
 0xc27   :  { %3045 = vmatpush3.bf16.xpose.msra.mxu1 %v1700_v48  ;;  %v1641_v17 = vpop.permute.xlu1 %1640  ;;  %3046 = vmatprep.mubr.msk.bf16.mxu1 %vm3333_vm0, %v3332_v0 }
 0xc28   :  { %3056 = vmatprep.subr.bf16.mxu1 %v3332_v0 }
 0xc29   :  { %v1693_v49 = vpop.permute.xlu0 %1692 }
 0xc2b   :  { %v1747_v50 = vpop.permute.xlu1 %1746 }
 0xc2c   :  { %v1752_v51 = vsel %vm146_vm2, %v1747_v50, 0  ;;  %3041 = vmatmul.mubr.msk.bf16.vlgmr.msra.gmra.mrb[48].mxu0 %vm146_vm2, %v1641_v17 }
 0xc2d   :  { %v1799_v21 = vpop.permute.xlu0 %1798  ;;  %3051 = vmatpush3.bf16.xpose.msra.mxu0 %v1752_v51  ;;  %3052 = vmatprep.mubr.msk.bf16.mxu0 %vm3333_vm0, %v3332_v0 }
 0xc2e   :  { %v1804_v53 = vsel %vm146_vm2, %v1799_v21, 0  ;;  %3047 = vmatmul.mubr.msk.bf16.vlgmr.msra.gmra.mrb[52].mxu1 %vm146_vm2, %v1693_v49  ;;  %3062 = vmatprep.subr.bf16.mxu0 %v3332_v0 }
 0xc2f   :  { %3057 = vmatpush3.bf16.xpose.msra.mxu1 %v1804_v53  ;;  %3058 = vmatprep.mubr.msk.bf16.mxu1 %vm3333_vm0, %v3332_v0  ;;  %v1745_v52 = vpop.permute.xlu1 %1744 }
 0xc30   :  { %3068 = vmatprep.subr.bf16.mxu1 %v3332_v0 }
 0xc31   :  { %v1797_v54 = vpop.permute.xlu0 %1796 }
 0xc34   :  { %3053 = vmatmul.mubr.msk.bf16.vlgmr.msra.gmra.mrb[52].mxu0 %vm146_vm2, %v1745_v52 }
 0xc35   :  { %3063 = vmatpush3.bf16.msra.mxu0 %v1946_v20  ;;  %3064 = vmatprep.mubr.msk.bf16.mxu0 %vm3333_vm0, %v3332_v0 }
 0xc36   :  { %3059 = vmatmul.mubr.msk.bf16.vlgmr.msra.gmra.mrb[56].mxu1 %vm146_vm2, %v1797_v54  ;;  %3074 = vmatprep.subr.bf16.mxu0 %v3332_v0 }
 0xc37   :  { %3069 = vmatpush3.bf16.msra.mxu1 %v1992_v55  ;;  %3070 = vmatprep.mubr.msk.bf16.mxu1 %vm3333_vm0, %v3332_v0 }
 0xc38   :  { %3080 = vmatprep.subr.bf16.mxu1 %v3332_v0 }
 0xc8e   :  { %v1528_v56 = vpop.f32.mrb[44].mxu1 }
 0xc8f   :  { %v3024_v57 = vpop.f32.mrb[45].mxu1  ;;  %v1849_v58 = vsel %vm146_vm2, %v1528_v56, -inf }
 0xc90   :  { %v1478_v59 = vpop.f32.mrb[40].mxu0  ;;  %1850 = vmax.xlane.f32.xlu0 %v1849_v58  ;;  %v1531_v60 = vpop.f32.mrb[46].mxu1 }
 0xc91   :  { %v3018_v61 = vpop.f32.mrb[41].mxu0  ;;  %v3025_v63 = vpop.f32.mrb[47].mxu1  ;;  %v1846_v62 = vsel %vm146_vm2, %v1478_v59, -inf }
 0xc92   :  { %1847 = vmax.xlane.f32.xlu1 %v1846_v62  ;;  %v1481_v1 = vpop.f32.mrb[42].mxu0 }
 0xc93   :  { %v3019_v2 = vpop.f32.mrb[43].mxu0 }
 0xcf7   :  { %v1580_v5 = vpop.f32.mrb[44].mxu0 }
 0xcf8   :  { %v3030_v6 = vpop.f32.mrb[45].mxu0  ;;  %v1852_v3 = vsel %vm146_vm2, %v1580_v5, -inf }
 0xcf9   :  { %v1583_v4 = vpop.f32.mrb[46].mxu0  ;;  %1853 = vmax.xlane.f32.xlu0 %v1852_v3  ;;  %v1632_v7 = vpop.f32.mrb[48].mxu1 }
 0xcfa   :  { %v3031_v8 = vpop.f32.mrb[47].mxu0  ;;  %v3036_v11 = vpop.f32.mrb[49].mxu1  ;;  %v1855_v12 = vsel %vm146_vm2, %v1632_v7, -inf }
 0xcfb   :  { %1856 = vmax.xlane.f32.xlu1 %v1855_v12  ;;  %v1635_v13 = vpop.f32.mrb[50].mxu1 }
 0xcfc   :  { %v3037_v16 = vpop.f32.mrb[51].mxu1 }
 0xcff   :  { %v1684_v22 = vpop.f32.mrb[48].mxu0 }
 0xd00   :  { %v3042_v19 = vpop.f32.mrb[49].mxu0  ;;  %v1858_v23 = vsel %vm146_vm2, %v1684_v22, -inf }
 0xd01   :  { %v1687_v25 = vpop.f32.mrb[50].mxu0  ;;  %1859 = vmax.xlane.f32.xlu0 %v1858_v23  ;;  %v1736_v27 = vpop.f32.mrb[52].mxu1 }
 0xd02   :  { %v3043_v31 = vpop.f32.mrb[51].mxu0  ;;  %v3048_v32 = vpop.f32.mrb[53].mxu1  ;;  %v1861_v33 = vsel %vm146_vm2, %v1736_v27, -inf }
 0xd03   :  { %1862 = vmax.xlane.f32.xlu1 %v1861_v33  ;;  %v1739_v34 = vpop.f32.mrb[54].mxu1 }
 0xd04   :  { %v3049_v15 = vpop.f32.mrb[55].mxu1 }
 0xd07   :  { %v1788_v35 = vpop.f32.mrb[52].mxu0 }
 0xd08   :  { %v3054_v36 = vpop.f32.mrb[53].mxu0  ;;  %v1864_v37 = vsel %vm146_vm2, %v1788_v35, -inf }
 0xd09   :  { %v1791_v38 = vpop.f32.mrb[54].mxu0  ;;  %1865 = vmax.xlane.f32.xlu0 %v1864_v37  ;;  %v1840_v39 = vpop.f32.mrb[56].mxu1  ;;  %v2084_v37 = vsel %vm654_vm3, %v3741_v26, 0 }
 0xd0a   :  { %v3055_v40 = vpop.f32.mrb[55].mxu0  ;;  %v3060_v41 = vpop.f32.mrb[57].mxu1  ;;  %v1867_v42 = vsel %vm146_vm2, %v1840_v39, -inf }
 0xd0b   :  { %1868 = vmax.xlane.f32.xlu1 %v1867_v42  ;;  %v1843_v43 = vpop.f32.mrb[58].mxu1 }
 0xd0c   :  { %v3061_v44 = vpop.f32.mrb[59].mxu1 }
 0xd1d   :  { %v1851_v14 = vpop.xlane.xlu0 %1850 }
 0xd1e   :  { %v1871_v45 = vsub.f32 %v1528_v56, %v1851_v14 }
 0xd1f   :  { %v1848_v46 = vpop.xlane.xlu1 %1847 }
 0xd20   :  { %v1880_v47 = vmul.f32 1.442695, %v1871_v45  ;;  %v1870_v48 = vsub.f32 %v1478_v59, %v1848_v46  ;;  %v2130_v46 = vsel %vm654_vm3, %v3749_v29, 0 }
 0xd22   :  { %3241 = vpow2.f32 %v1880_v47  ;;  %v1878_v17 = vmul.f32 1.442695, %v1870_v48 }
 0xd24   :  { %3243 = vpow2.f32 %v1878_v17  ;;  %v2176_v17 = vsel %vm654_vm3, %v3746_v28, 0  ;;  %v2222_v28 = vsel %vm654_vm3, %v3757_v18, 0 }
 0xd2c   :  { %v3242_v49 = vpop.eup %3241 }
 0xd2d   :  { %v1897_v50 = vsel %vm146_vm2, %v3242_v49, 0.0 }
 0xd2e   :  { %v3244_v51 = vpop.eup %3243  ;;  %1898 = vadd.xlane.f32.xlu1 %v1897_v50 }
 0xd2f   :  { %v1894_v21 = vsel %vm146_vm2, %v3244_v51, 0.0 }
 0xd30   :  { %1895 = vadd.xlane.f32.xlu0 %v1894_v21 }
 0xd86   :  { %v1854_v53 = vpop.xlane.xlu0 %1853 }
 0xd87   :  { %v1872_v52 = vsub.f32 %v1580_v5, %v1854_v53 }
 0xd88   :  { %v1857_v20 = vpop.xlane.xlu1 %1856 }
 0xd89   :  { %v1882_v54 = vmul.f32 1.442695, %v1872_v52  ;;  %v1873_v55 = vsub.f32 %v1632_v7, %v1857_v20  ;;  %v2268_v20 = vsel %vm654_vm3, %v3752_v30, 0 }
 0xd8b   :  { %3245 = vpow2.f32 %v1882_v54  ;;  %v1884_v56 = vmul.f32 1.442695, %v1873_v55 }
 0xd8d   :  { %3247 = vpow2.f32 %v1884_v56 }
 0xd8e   :  { %v1860_v57 = vpop.xlane.xlu0 %1859 }
 0xd8f   :  { %v1874_v58 = vsub.f32 %v1684_v22, %v1860_v57 }
 0xd90   :  { %v1863_v59 = vpop.xlane.xlu1 %1862 }
 0xd91   :  { %v1886_v60 = vmul.f32 1.442695, %v1874_v58  ;;  %v1875_v61 = vsub.f32 %v1736_v27, %v1863_v59 }
 0xd93   :  { %3249 = vpow2.f32 %v1886_v60  ;;  %v1888_v63 = vmul.f32 1.442695, %v1875_v61 }
 0xd95   :  { %v3246_v62 = vpop.eup %3245  ;;  %3251 = vpow2.f32 %v1888_v63 }
 0xd96   :  { %v1866_v1 = vpop.xlane.xlu0 %1865  ;;  %v1900_v2 = vsel %vm146_vm2, %v3246_v62, 0.0 }
 0xd97   :  { %v3248_v6 = vpop.eup %3247  ;;  %v1876_v5 = vsub.f32 %v1788_v35, %v1866_v1  ;;  %1901 = vadd.xlane.f32.xlu0 %v1900_v2 }
 0xd98   :  { %v1869_v3 = vpop.xlane.xlu1 %1868  ;;  %v1903_v4 = vsel %vm146_vm2, %v3248_v6, 0.0 }
 0xd99   :  { %v1890_v7 = vmul.f32 1.442695, %v1876_v5  ;;  %v1877_v8 = vsub.f32 %v1840_v39, %v1869_v3  ;;  %1904 = vadd.xlane.f32.xlu1 %v1903_v4  ;;  %v2038_v39 = vsel %vm654_vm3, %v3737_v24, 0 }
 0xd9b   :  { %3253 = vpow2.f32 %v1890_v7  ;;  %v1892_v11 = vmul.f32 1.442695, %v1877_v8  ;;  %v3193_v7 = vld [vmem:[%s3985_s2 + $0x10] sm:$0xff]  }
 0xd9d   :  { %v3250_v12 = vpop.eup %3249  ;;  %3255 = vpow2.f32 %v1892_v11 }
 0xd9e   :  { %v1906_v13 = vsel %vm146_vm2, %v3250_v12, 0.0 }
 0xd9f   :  { %v3252_v16 = vpop.eup %3251  ;;  %1907 = vadd.xlane.f32.xlu0 %v1906_v13 }
 0xda0   :  { %v1909_v22 = vsel %vm146_vm2, %v3252_v16, 0.0 }
 0xda1   :  { %1910 = vadd.xlane.f32.xlu1 %v1909_v22 }
 0xda5   :  { %v3833_v19 = vpop.eup %3253 }
 0xda6   :  { %v1912_v23 = vsel %vm146_vm2, %v3833_v19, 0.0 }
 0xda7   :  { %v3837_v25 = vpop.eup %3255  ;;  %1913 = vadd.xlane.f32.xlu0 %v1912_v23 }
 0xda8   :  { %v1915_v27 = vsel %vm146_vm2, %v3837_v25, 0.0 }
 0xda9   :  { %1916 = vadd.xlane.f32.xlu1 %v1915_v27  ;;  %v3194_v27 = vld [vmem:[%s3985_s2 + $0x18] sm:$0xff]  }
 0xdbb   :  { %v1899_v31 = vpop.xlane.xlu1 %1898 }
 0xdbc   :  { %3257 = vrcp.f32 %v1899_v31 }
 0xdbd   :  { %v1896_v32 = vpop.xlane.xlu0 %1895 }
 0xdbe   :  { %3259 = vrcp.f32 %v1896_v32 }
 0xdc6   :  { %v3258_v33 = vpop.eup %3257 }
 0xdc7   :  { %v1927_v34 = vmul.f32 %v3258_v33, %v3242_v49 }
 0xdc8   :  { %v3260_v15 = vpop.eup %3259 }
 0xdc9   :  { %v1926_v35 = vmul.f32 %v3260_v15, %v3244_v51  ;;  %v1935_v36 = vpack.c.bf16 %v1927_v34, %v1927_v34 }
 0xdcb   :  { %3071 = vmatmul.mubr.msk.bf16.vlgmr.msra.gmra.mrb[60].mxu1 %vm146_vm2, %v1935_v36  ;;  %v1934_v38 = vpack.c.bf16 %v1926_v35, %v1926_v35 }
 0xdcc   :  { %3081 = vmatpush3.bf16.msra.mxu1 %v2084_v37  ;;  %3082 = vmatprep.mubr.msk.bf16.mxu1 %vm3333_vm0, %v3332_v0 }
 0xdcd   :  { %3065 = vmatmul.mubr.msk.bf16.vlgmr.msra.gmra.mrb[56].mxu0 %vm146_vm2, %v1934_v38  ;;  %3092 = vmatprep.subr.bf16.mxu1 %v3332_v0 }
 0xdce   :  { %3075 = vmatpush3.bf16.msra.mxu0 %v2038_v39  ;;  %3076 = vmatprep.mubr.msk.bf16.mxu0 %vm3333_vm0, %v3332_v0 }
 0xdcf   :  { %3086 = vmatprep.subr.bf16.mxu0 %v3332_v0 }
 0xe24   :  { %v1902_v26 = vpop.xlane.xlu0 %1901 }
 0xe25   :  { %3261 = vrcp.f32 %v1902_v26 }
 0xe26   :  { %v1905_v40 = vpop.xlane.xlu1 %1904 }
 0xe27   :  { %3263 = vrcp.f32 %v1905_v40 }
 0xe2c   :  { %v1908_v41 = vpop.xlane.xlu0 %1907 }
 0xe2d   :  { %3265 = vrcp.f32 %v1908_v41 }
 0xe2e   :  { %v1911_v42 = vpop.xlane.xlu1 %1910 }
 0xe2f   :  { %v3262_v43 = vpop.eup %3261  ;;  %3267 = vrcp.f32 %v1911_v42 }
 0xe30   :  { %v1928_v24 = vmul.f32 %v3262_v43, %v3246_v62 }
 0xe31   :  { %v3264_v44 = vpop.eup %3263 }
 0xe32   :  { %v1929_v14 = vmul.f32 %v3264_v44, %v3248_v6  ;;  %v1936_v45 = vpack.c.bf16 %v1928_v24, %v1928_v24 }
 0xe34   :  { %3077 = vmatmul.mubr.msk.bf16.vlgmr.msra.gmra.mrb[60].mxu0 %vm146_vm2, %v1936_v45  ;;  %v1914_v47 = vpop.xlane.xlu0 %1913  ;;  %v1937_v48 = vpack.c.bf16 %v1929_v14, %v1929_v14 }
 0xe35   :  { %3087 = vmatpush3.bf16.msra.mxu0 %v2130_v46  ;;  %3269 = vrcp.f32 %v1914_v47  ;;  %3088 = vmatprep.mubr.msk.bf16.mxu0 %vm3333_vm0, %v3332_v0 }
 0xe36   :  { %3083 = vmatmul.mubr.msk.bf16.vlgmr.msra.gmra.mrb[64].mxu1 %vm146_vm2, %v1937_v48  ;;  %v1917_v49 = vpop.xlane.xlu1 %1916  ;;  %3098 = vmatprep.subr.bf16.mxu0 %v3332_v0 }
 0xe37   :  { %v3266_v50 = vpop.eup %3265  ;;  %3093 = vmatpush3.bf16.msra.mxu1 %v2176_v17  ;;  %3271 = vrcp.f32 %v1917_v49  ;;  %3094 = vmatprep.mubr.msk.bf16.mxu1 %vm3333_vm0, %v3332_v0 }
 0xe38   :  { %v1930_v29 = vmul.f32 %v3266_v50, %v3250_v12  ;;  %3104 = vmatprep.subr.bf16.mxu1 %v3332_v0 }
 0xe39   :  { %v3268_v51 = vpop.eup %3267 }
 0xe3a   :  { %v1931_v21 = vmul.f32 %v3268_v51, %v3252_v16  ;;  %v1938_v53 = vpack.c.bf16 %v1930_v29, %v1930_v29 }
 0xe3c   :  { %3089 = vmatmul.mubr.msk.bf16.vlgmr.msra.gmra.mrb[64].mxu0 %vm146_vm2, %v1938_v53  ;;  %v1939_v52 = vpack.c.bf16 %v1931_v21, %v1931_v21 }
 0xe3d   :  { %3099 = vmatpush3.bf16.msra.mxu0 %v2222_v28  ;;  %3100 = vmatprep.mubr.msk.bf16.mxu0 %vm3333_vm0, %v3332_v0 }
 0xe3e   :  { %3095 = vmatmul.mubr.msk.bf16.vlgmr.msra.gmra.mrb[68].mxu1 %vm146_vm2, %v1939_v52  ;;  %3110 = vmatprep.subr.bf16.mxu0 %v3332_v0  ;;  %v2746_v52 = vld [vmem:[%s3986_s3 + $0x1] ss:$0 sm:$0xff] }
 0xe3f   :  { %v3270_v54 = vpop.eup %3269  ;;  %3105 = vmatpush3.bf16.msra.mxu1 %v2268_v20  ;;  %3106 = vmatprep.mubr.msk.bf16.mxu1 %vm3333_vm0, %v3332_v0 }
 0xe40   :  { %v1932_v18 = vmul.f32 %v3270_v54, %v3833_v19  ;;  %3118 = vmatprep.subr.bf16.mxu1 %v3332_v0 }
 0xe41   :  { %v3272_v55 = vpop.eup %3271 }
 0xe42   :  { %v1933_v56 = vmul.f32 %v3272_v55, %v3837_v25  ;;  %v1940_v57 = vpack.c.bf16 %v1932_v18, %v1932_v18 }
 0xe44   :  { %3101 = vmatmul.mubr.msk.bf16.vlgmr.msra.gmra.mrb[68].mxu0 %vm146_vm2, %v1940_v57  ;;  %v1941_v30 = vpack.c.bf16 %v1933_v56, %v1933_v56 }
 0xe45   :  { %3114 = vmatprep.mubr.msk.bf16.mxu0 %vm3333_vm0, %v3332_v0  ;;  %3111 = vmatpush3.bf16.msra.mxu0 %v3193_v7  ;;  %v3196_v7 = vld [vmem:[%s3989_s6 + $0x18] sm:$0xff]  }
 0xe46   :  { %3107 = vmatmul.mubr.msk.bf16.vlgmr.msra.gmra.mrb[72].mxu1 %vm146_vm2, %v1941_v30  ;;  %3112 = vmatprep.subr.bf16.mxu0 %v3332_v0 }
 0xe47   :  { %3122 = vmatprep.mubr.msk.bf16.mxu1 %vm3333_vm0, %v3332_v0 }
 0xe49   :  { %3113 = vmatpush3.bf16.msra.mxu0 %v3194_v27 }
 0xe4a   :  { %3126 = vmatprep.subr.bf16.mxu0 %v3332_v0 }
 0xe9e   :  { %v2028_v58 = vpop.f32.mrb[60].mxu1 }
 0xe9f   :  { %v3072_v59 = vpop.f32.mrb[61].mxu1 }
 0xea0   :  { %v1982_v60 = vpop.f32.mrb[56].mxu0  ;;  %v2031_v61 = vpop.f32.mrb[62].mxu1 }
 0xea1   :  { %v3066_v63 = vpop.f32.mrb[57].mxu0  ;;  %v3073_v62 = vpop.f32.mrb[63].mxu1 }
 0xea2   :  { %v1985_v1 = vpop.f32.mrb[58].mxu0 }
 0xea3   :  { %v3067_v2 = vpop.f32.mrb[59].mxu0 }
 0xf07   :  { %v2074_v6 = vpop.f32.mrb[60].mxu0 }
 0xf08   :  { %v3078_v5 = vpop.f32.mrb[61].mxu0 }
 0xf09   :  { %v2077_v3 = vpop.f32.mrb[62].mxu0  ;;  %v2120_v4 = vpop.f32.mrb[64].mxu1 }
 0xf0a   :  { %v3166_v8 = vpack.i.bf16 %v2120_v4, %v2074_v6  ;;  %v3079_v11 = vpop.f32.mrb[63].mxu0  ;;  %v3084_v12 = vpop.f32.mrb[65].mxu1 }
 0xf0b   :  { %v2123_v13 = vpop.f32.mrb[66].mxu1  ;;  %v3198_v11 = vld [vmem:[%s3991_s8 + $0x28] sm:$0xff]  }
 0xf0c   :  { %3167 = vrot.lane.b32.xlu0 %v3166_v8, %s3331_s24  ;;  %v3085_v16 = vpop.f32.mrb[67].mxu1  ;;  %v3197_v8 = vld [vmem:[%s3991_s8 + $0x20] sm:$0xff]  }
 0xf0f   :  { %v2166_v22 = vpop.f32.mrb[64].mxu0 }
 0xf10   :  { %v3090_v19 = vpop.f32.mrb[65].mxu0 }
 0xf11   :  { %v2169_v23 = vpop.f32.mrb[66].mxu0  ;;  %v2212_v25 = vpop.f32.mrb[68].mxu1 }
 0xf12   :  { %v3171_v31 = vpack.i.bf16 %v2212_v25, %v2166_v22  ;;  %v3091_v32 = vpop.f32.mrb[67].mxu0  ;;  %v3096_v33 = vpop.f32.mrb[69].mxu1 }
 0xf13   :  { %v2215_v34 = vpop.f32.mrb[70].mxu1 }
 0xf14   :  { %3172 = vrot.lane.b32.xlu1 %v3171_v31, %s3339_s19  ;;  %v3097_v15 = vpop.f32.mrb[71].mxu1  ;;  %v3932_v31 = vld [vmem:[%s3987_s4 + $0x1] ss:$0 sm:$0xff] }
 0xf15   :  { %v3938_v15 = vld [vmem:[%s3988_s5 + $0x1] ss:$0 sm:$0xff] }
 0xf17   :  { %v2258_v35 = vpop.f32.mrb[68].mxu0 }
 0xf18   :  { %v3102_v36 = vpop.f32.mrb[69].mxu0 }
 0xf19   :  { %v2261_v37 = vpop.f32.mrb[70].mxu0  ;;  %v2304_v38 = vpop.f32.mrb[72].mxu1 }
 0xf1a   :  { %v3176_v39 = vpack.i.bf16 %v2304_v38, %v2258_v35  ;;  %v3103_v26 = vpop.f32.mrb[71].mxu0  ;;  %v3108_v40 = vpop.f32.mrb[73].mxu1 }
 0xf1b   :  { %v2307_v41 = vpop.f32.mrb[74].mxu1  ;;  %v3200_v26 = vld [vmem:[%s3991_s8 + $0x38] sm:$0xff]   ;;  %v2759_v40 = vld [vmem:[%s3990_s7 + $0x1] ss:$0 sm:$0xff]  ;;  %s3341_s7 = smov [#allocation5]  }
 0xf1c   :  { %3177 = vrot.lane.b32.xlu1 %v3176_v39, %s3340_s20  ;;  %v3109_v42 = vpop.f32.mrb[75].mxu1  ;;  %v3199_v39 = vld [vmem:[%s3991_s8 + $0x30] sm:$0xff]   ;;  %s2655_s8 = sshll.u32 %s3341_s7, 4  ;;  %s2656_s8 = int_to_ptr.vmem [resolvable:$true] %s2655_s8 }
 0xf1d   :  { %p3308_p9 = scmp.lt.s32.totalorder %s2656_s8, %s2656_s8 }
 0xf7e   :  { %v3168_v43 = vpop.permute.xlu0 %3167 }
 0xf7f   :  { %v3170_v44 = vunpack.i.h.bf16 %v3168_v43  ;;  %v3169_v14 = vunpack.i.l.bf16 %v3168_v43 }
 0xf81   :  { %v2335_v48 = vsel %vm146_vm2, %v2028_v58, %v3170_v44  ;;  %v2334_v17 = vsel %vm146_vm2, %v1982_v60, %v3169_v14 }
 0xf86   :  { %v3173_v24 = vpop.permute.xlu1 %3172 }
 0xf87   :  { %v3175_v45 = vunpack.i.h.bf16 %v3173_v24  ;;  %v3174_v46 = vunpack.i.l.bf16 %v3173_v24 }
 0xf89   :  { %v2337_v29 = vsel %vm1046_vm4, %v2335_v48, %v3175_v45  ;;  %v2336_v51 = vsel %vm1046_vm4, %v2334_v17, %v3174_v46 }
 0xf8e   :  { %v3178_v47 = vpop.permute.xlu1 %3177 }
 0xf8f   :  { %v3180_v49 = vunpack.i.h.bf16 %v3178_v47  ;;  %v3179_v50 = vunpack.i.l.bf16 %v3178_v47 }
 0xf91   :  { %v2339_v21 = vsel %vm1049_vm5, %v2337_v29, %v3180_v49  ;;  %v2338_v53 = vsel %vm1049_vm5, %v2336_v51, %v3179_v50 }
 0xf92   :  { %v2340_v28 = vpack.c.bf16 %v2339_v21, %v2338_v53 }
 0xf94   :  { %3115 = vmatmul.mubr.msk.bf16.vlgmr.msra.gmra.mrb[72].mxu0 %vm57_vm1, %v2340_v28 }
 0xf95   :  { %3134 = vmatprep.mubr.msk.bf16.mxu0 %vm3333_vm0, %v3332_v0  ;;  %3127 = vmatpush3.bf16.msra.mxu0 %v3197_v8 }
 0xf96   :  { %3128 = vmatprep.subr.bf16.mxu0 %v3332_v0 }
 0xf99   :  { %3129 = vmatpush3.bf16.msra.mxu0 %v3198_v11 }
 0xf9a   :  { %3130 = vmatprep.subr.bf16.mxu0 %v3332_v0 }
 0xf9d   :  { %3131 = vmatpush3.bf16.msra.mxu0 %v3199_v39 }
 0xf9e   :  { %3132 = vmatprep.subr.bf16.mxu0 %v3332_v0 }
 0xfa1   :  { %3133 = vmatpush3.bf16.msra.mxu0 %v3200_v26 }
0x1067   :  { %v2403_v20 = vpop.f32.mrb[72].mxu0 }
0x1068   :  { %v2404_v54 = vadd.f32 %v2746_v52, %v2403_v20  ;;  %v3116_v18 = vpop.f32.mrb[73].mxu0 }
0x1069   :  { %v2406_v55 = vpop.f32.mrb[74].mxu0 }
0x106a   :  { %v2407_v56 = vadd.f32 %v2746_v52, %v2406_v55  ;;  %v3117_v57 = vpop.f32.mrb[75].mxu0  ;;  %v2414_v30 = vadd.f32 %v2404_v54, %v3703_v9 }
0x106c   :  { %v2416_v58 = vsel %vm57_vm1, %v2414_v30, 0.0  ;;  %v2415_v59 = vadd.f32 %v2407_v56, %v3706_v10  ;;  %v3195_v10 = vld [vmem:[%s3989_s6 + $0x10] sm:$0xff]  }
0x106d   :  { %2417 = vadd.xlane.f32.xlu0 %v2416_v58  ;;  %3119 = vmatpush3.bf16.msra.mxu1 %v3195_v10 }
0x106e   :  { %v2419_v60 = vsel %vm57_vm1, %v2415_v59, 0.0  ;;  %3120 = vmatprep.subr.bf16.mxu1 %v3332_v0  ;;  %v2772_v0 = vld [vmem:[%s3992_s9 + $0x1] ss:$0 sm:$0xff]  ;;  %s3303_s9 = scalar_lea.vmem %s2656_s8, 256 }
0x106f   :  { %2420 = vadd.xlane.f32.xlu1 %v2419_v60  ;;  %p3304_p8 = scmp.ne.s32.totalorder %s2656_s8, %s3303_s9  ;;  %p3309_p10 = scmp.lt.s32.totalorder %s3303_s9, %s3303_s9 }
0x1071   :  { %3121 = vmatpush3.bf16.msra.mxu1 %v3196_v7  ;;  %p3310_p11 = por %p3309_p10, %p3308_p9 }
0x1073   :  { %p3311_p12 = pnand %p3310_p11, %p3304_p8 }
0x10fa   :  { %v2418_v61 = vpop.xlane.xlu0 %2417 }
0x10fb   :  { %v2422_v63 = vmul.f32 0.03125, %v2418_v61 }
0x10fc   :  { %v2421_v62 = vpop.xlane.xlu1 %2420 }
0x10fd   :  { %v2424_v1 = vsub.f32 %v2414_v30, %v2422_v63  ;;  %v2423_v2 = vmul.f32 0.03125, %v2421_v62 }
0x10ff   :  { %v2425_v6 = vsub.f32 %v2415_v59, %v2423_v2  ;;  %v2426_v5 = vmul.f32 %v2424_v1, %v2424_v1 }
0x1101   :  { %v2428_v3 = vsel %vm57_vm1, %v2426_v5, 0.0  ;;  %v2427_v4 = vmul.f32 %v2425_v6, %v2425_v6 }
0x1102   :  { %2429 = vadd.xlane.f32.xlu0 %v2428_v3 }
0x1103   :  { %v2431_v9 = vsel %vm57_vm1, %v2427_v4, 0.0 }
0x1106   :  { %2432 = vadd.xlane.f32.xlu0 %v2431_v9 }
0x118f   :  { %v2430_v12 = vpop.xlane.xlu0 %2429 }
0x1190   :  { %v2434_v13 = vmul.f32 0.03125, %v2430_v12 }
0x1192   :  { %v2436_v16 = vadd.f32 1e-05, %v2434_v13 }
0x1193   :  { %v2433_v22 = vpop.xlane.xlu0 %2432 }
0x1194   :  { %3273 = vrsqrt.f32 %v2436_v16  ;;  %v2435_v19 = vmul.f32 0.03125, %v2433_v22 }
0x1196   :  { %v2437_v23 = vadd.f32 1e-05, %v2435_v19 }
0x1198   :  { %3275 = vrsqrt.f32 %v2437_v23 }
0x119e   :  { %v3274_v25 = vpop.eup %3273 }
0x119f   :  { %v2440_v27 = vmul.f32 %v3274_v25, %v2424_v1 }
0x11a1   :  { %v2448_v33 = vmul.f32 %v3932_v31, %v2440_v27 }
0x11a2   :  { %v3276_v32 = vpop.eup %3275 }
0x11a3   :  { %v2441_v34 = vmul.f32 %v3276_v32, %v2425_v6  ;;  %v2456_v36 = vadd.f32 %v3938_v15, %v2448_v33 }
0x11a5   :  { %v2449_v35 = vmul.f32 %v3932_v31, %v2441_v34 }
0x11a7   :  { %v2457_v37 = vadd.f32 %v3938_v15, %v2449_v35 }
0x11a9   :  { %v2458_v38 = vpack.c.bf16 %v2457_v37, %v2456_v36 }
0x11ab   :  { %3123 = vmatmul.mubr.msk.bf16.vlgmr.msra.gmra.mrb[76].mxu1 %vm57_vm1, %v2458_v38 }
0x127e   :  { %v2521_v41 = vpop.f32.mrb[76].mxu1 }
0x127f   :  { %v2522_v42 = vadd.f32 %v2759_v40, %v2521_v41  ;;  %v3124_v43 = vpop.f32.mrb[77].mxu1 }
0x1280   :  { %v2524_v24 = vpop.f32.mrb[78].mxu1 }
0x1281   :  { %v2525_v44 = vadd.f32 %v2759_v40, %v2524_v24  ;;  %v3125_v14 = vpop.f32.mrb[79].mxu1  ;;  %v2528_v45 = vmax.f32 %v2522_v42, 0.0 }
0x1283   :  { %v2529_v46 = vmax.f32 %v2525_v44, 0.0 }
0x1285   :  { %v2530_v47 = vpack.c.bf16 %v2529_v46, %v2528_v45 }
0x1287   :  { %3135 = vmatmul.mubr.msk.bf16.vlgmr.msra.gmra.mrb[76].mxu0 %vm1277_vm6, %v2530_v47 }
0x135a   :  { %v2609_v48 = vpop.f32.mrb[76].mxu0 }
0x135b   :  { %v2610_v17 = vadd.f32 %v2772_v0, %v2609_v48  ;;  %v3136_v49 = vpop.f32.mrb[77].mxu0 }
0x135c   :  { %v2612_v50 = vpop.f32.mrb[78].mxu0 }
0x135d   :  { %v2613_v29 = vadd.f32 %v2772_v0, %v2612_v50  ;;  %v3137_v51 = vpop.f32.mrb[79].mxu0  ;;  %v2616_v21 = vadd.f32 %v2610_v17, %v2456_v36 }
0x135f   :  { %v2618_v53 = vsel %vm57_vm1, %v2616_v21, 0.0  ;;  %v2617_v28 = vadd.f32 %v2613_v29, %v2457_v37 }
0x1360   :  { %2619 = vadd.xlane.f32.xlu1 %v2618_v53 }
0x1361   :  { %v2621_v52 = vsel %vm57_vm1, %v2617_v28, 0.0 }
0x1362   :  { %2622 = vadd.xlane.f32.xlu0 %v2621_v52 }
0x13ed   :  { %v2620_v20 = vpop.xlane.xlu1 %2619 }
0x13ee   :  { %v2624_v54 = vmul.f32 0.03125, %v2620_v20 }
0x13ef   :  { %v2623_v18 = vpop.xlane.xlu0 %2622 }
0x13f0   :  { %v2626_v55 = vsub.f32 %v2616_v21, %v2624_v54  ;;  %v2625_v56 = vmul.f32 0.03125, %v2623_v18 }
0x13f2   :  { %v2627_v57 = vsub.f32 %v2617_v28, %v2625_v56  ;;  %v2628_v30 = vmul.f32 %v2626_v55, %v2626_v55 }
0x13f4   :  { %v2630_v58 = vsel %vm57_vm1, %v2628_v30, 0.0  ;;  %v2629_v59 = vmul.f32 %v2627_v57, %v2627_v57 }
0x13f5   :  { %2631 = vadd.xlane.f32.xlu1 %v2630_v58 }
0x13f6   :  { %v2633_v60 = vsel %vm57_vm1, %v2629_v59, 0.0 }
0x13f7   :  { %2634 = vadd.xlane.f32.xlu0 %v2633_v60 }
0x1482   :  { %v2632_v61 = vpop.xlane.xlu1 %2631 }
0x1483   :  { %v2636_v63 = vmul.f32 0.03125, %v2632_v61 }
0x1484   :  { %v2635_v62 = vpop.xlane.xlu0 %2634 }
0x1485   :  { %v2638_v1 = vadd.f32 1e-05, %v2636_v63  ;;  %v2637_v2 = vmul.f32 0.03125, %v2635_v62 }
0x1487   :  { %3277 = vrsqrt.f32 %v2638_v1  ;;  %v2639_v6 = vadd.f32 1e-05, %v2637_v2 }
0x1489   :  { %3279 = vrsqrt.f32 %v2639_v6 }
0x1491   :  { %v3278_v5 = vpop.eup %3277 }
0x1492   :  { %v2642_v3 = vmul.f32 %v3278_v5, %v2626_v55 }
0x1493   :  { %v3280_v4 = vpop.eup %3279 }
0x1494   :  { %v2644_v9 = vmul.f32 %v3932_v31, %v2642_v3  ;;  %v2643_v10 = vmul.f32 %v3280_v4, %v2627_v57 }
0x1496   :  { %v2646_v7 = vadd.f32 %v3938_v15, %v2644_v9  ;;  %v2645_v8 = vmul.f32 %v3932_v31, %v2643_v10 }
0x1498   :  { %2648 = vst.msk [vmem:[#allocation5] sm:$0xff] %vm57_vm1, %v2646_v7  ;;  %v2647_v11 = vadd.f32 %v3938_v15, %v2645_v8 }
0x149a   :  { %2649 = vst.msk [vmem:[#allocation5 + $0x8] sm:$0xff] %vm57_vm1, %v2647_v11 }
0x149b   :  { %3314 = shalt.err (!%p3311_p12)
}
0x149c   :  { %s3315_s12 = scalar_lea.hbm %s3993_s10, 256 }
0x149d   :  { %p3316_p13 = scmp.ne.s32.totalorder %s3993_s10, %s3315_s12  ;;  %p3319_p0 = scmp.lt.u32.totalorder %s3315_s12, %s3993_s10 }
0x149f   :  { %p3321_p1 = pnand %p3319_p0, %p3316_p13 }
0x14a1   :  { %3324 = shalt.err (!%p3321_p1)
}
0x14a2   :  { %2661 = dma.vmem_to_hbm [thread:$0]  %s2656_s8, 256, %s3993_s10, [#allocation4], %s3330_s23, %s3330_s23, %s3331_s24  }
0x14a3   :  { %3327 = dma.done.wait [#allocation4], 256  }
0x14a4   :  { %3328 = vsyncadd [#allocation4], 4294967040 }
0x14a5   :  { %2665 = vsyncpa [#allocation3], 1 }
0x14a6   :  { %2666 = vsyncpa [#allocation4], 1 }

</bundles_post_ra>
